<compile_context>
chip_gen: v7x
topology: tpu7x:2x2x1
jax: 0.10.0
libtpu: 0.0.40
codegen_flags: <defaults>
</compile_context>

<pallas_src>
import functools

import jax
import jax.numpy as jnp
from jax.experimental import pallas as pl
from jax.experimental.pallas import tpu as pltpu


def _conv_relu_kernel(x_ref, w_ref, b_ref, o_ref, acc_ref, *, TH, W, C_in_p, C_out_p):
    # x_ref  : (1, H+2, W+2, C_in_p)   spatially padded input, resident per batch element
    # w_ref  : (9, C_in_p, C_out_p)    per-tap weights, tap index = dy*3 + dx
    # b_ref  : (1, C_out_p)            bias (lane-dense)
    # o_ref  : (1, TH, W, C_out_p)     output tile (lane-dense store)
    # acc_ref: (TH*W, C_out_p) f32     VMEM accumulator scratch
    ht = pl.program_id(1)
    h0 = pl.multiple_of(ht * TH, TH)          # element offset into padded-H axis

    tap = 0
    for dy in range(3):
        for dx in range(3):
            # (TH, W, C_in_p) patch for this tap; single vld per tap from the
            # resident padded block, flattened to an explicit 2-D MXU operand.
            patch = x_ref[0, pl.ds(h0 + dy, TH), pl.ds(dx, W), :]
            lhs = patch.reshape(TH * W, C_in_p)
            prod = jnp.dot(lhs, w_ref[tap], preferred_element_type=jnp.float32)
            if tap == 0:
                acc_ref[...] = prod
            else:
                acc_ref[...] += prod
            tap += 1

    # Single bias broadcast + ReLU + one lane-dense store per tile.
    out = jnp.maximum(acc_ref[...] + b_ref[...], 0.0)
    o_ref[...] = out.reshape(1, TH, W, C_out_p).astype(o_ref.dtype)


def conv_relu_pallas(x_nchw, weight, bias, *, tile_h=8):
    """3x3 conv (stride 1, pad 1) + bias + ReLU.

    x_nchw : (N, C_in, H, W)      float32 (PyTorch NCHW layout)
    weight : (C_out, C_in, 3, 3)  PyTorch Conv2d weight layout
    bias   : (C_out,)
    """
    N, C_in, H, W = x_nchw.shape
    C_out = weight.shape[0]

    LANE = 128
    C_in_p = ((C_in + LANE - 1) // LANE) * LANE
    C_out_p = ((C_out + LANE - 1) // LANE) * LANE

    TH = tile_h if H % tile_h == 0 else H
    assert H % TH == 0

    # --- glue: NCHW -> NHWC once, pad channels to lane multiple, pad spatial by 1.
    # TODO(synk): if the surrounding graph is channels-last already, accept
    # (N, H, W, C) directly and skip these two transposes.
    x = jnp.transpose(x_nchw, (0, 2, 3, 1))
    x = jnp.pad(x, ((0, 0), (1, 1), (1, 1), (0, C_in_p - C_in)))

    # weight (C_out, C_in, 3, 3) -> (3, 3, C_in, C_out) -> (9, C_in_p, C_out_p)
    w = jnp.transpose(weight, (2, 3, 1, 0)).reshape(9, C_in, C_out)
    w = jnp.pad(w, ((0, 0), (0, C_in_p - C_in), (0, C_out_p - C_out)))
    b = jnp.pad(bias, (0, C_out_p - C_out)).reshape(1, C_out_p)

    kernel = functools.partial(
        _conv_relu_kernel, TH=TH, W=W, C_in_p=C_in_p, C_out_p=C_out_p)

    out = pl.pallas_call(
        kernel,
        out_shape=jax.ShapeDtypeStruct((N, H, W, C_out_p), x_nchw.dtype),
        grid_spec=pltpu.PrefetchScalarGridSpec(
            num_scalar_prefetch=0,
            grid=(N, H // TH),
            in_specs=[
                # padded input image stays resident across the H-tile axis
                pl.BlockSpec((1, H + 2, W + 2, C_in_p), lambda n, ht: (n, 0, 0, 0)),
                pl.BlockSpec((9, C_in_p, C_out_p), lambda n, ht: (0, 0, 0)),
                pl.BlockSpec((1, C_out_p), lambda n, ht: (0, 0)),
            ],
            out_specs=pl.BlockSpec((1, TH, W, C_out_p),
                                   lambda n, ht: (n, ht, 0, 0)),
            scratch_shapes=[pltpu.VMEM((TH * W, C_out_p), jnp.float32)],
        ),
        compiler_params=pltpu.CompilerParams(
            dimension_semantics=("parallel", "parallel"),
            vmem_limit_bytes=32 * 1024 * 1024,
        ),
    )(x, w, b)

    # drop padded output channels, NHWC -> NCHW
    return jnp.transpose(out[..., :C_out], (0, 3, 1, 2))


def conv_relu_reference(x_nchw, weight, bias):
    """Pure-JAX reference: lax conv (NCHW / OIHW) + bias + ReLU."""
    y = jax.lax.conv_general_dilated(
        x_nchw, weight,
        window_strides=(1, 1),
        padding=((1, 1), (1, 1)),
        dimension_numbers=("NCHW", "OIHW", "NCHW"),
    )
    return jnp.maximum(y + bias[None, :, None, None], 0.0)


if __name__ == "__main__":
    # Small shapes consistent with ConvRelu(in_, out): in_=32, out=16, 16x16 maps.
    N, C_in, C_out, H, W = 2, 32, 16, 16, 16

    key = jax.random.PRNGKey(0)
    kx, kw, kb = jax.random.split(key, 3)

    x = jax.random.normal(kx, (N, C_in, H, W), dtype=jnp.float32)
    # deterministic Conv2d-like uniform init
    fan_in = C_in * 3 * 3
    bound = 1.0 / (fan_in ** 0.5)
    weight = jax.random.uniform(kw, (C_out, C_in, 3, 3),
                                minval=-bound, maxval=bound, dtype=jnp.float32)
    bias = jax.random.uniform(kb, (C_out,), minval=-bound, maxval=bound,
                              dtype=jnp.float32)

    out = jax.block_until_ready(conv_relu_pallas(x, weight, bias))
    ref = jax.block_until_ready(conv_relu_reference(x, weight, bias))

    assert out.shape == (N, C_out, H, W)
    max_err = float(jnp.max(jnp.abs(out - ref)))
    assert max_err < 2e-3, f"max err {max_err}"

    print("KERNEL_OK")
</pallas_src>

<mosaic_0001>
module attributes {stable_mosaic.version = 11 : i64} {
  func.func @_conv_relu_kernel(%arg0: i32, %arg1: i32, %arg2: memref<1x18x18x128xf32, #tpu.memory_space<vmem>>, %arg3: memref<9x128x128xf32, #tpu.memory_space<vmem>>, %arg4: memref<1x128xf32, #tpu.memory_space<vmem>>, %arg5: memref<1x8x16x128xf32, #tpu.memory_space<vmem>>, %arg6: memref<128x128xf32, #tpu.memory_space<vmem>>) attributes {dimension_semantics = [#tpu.dimension_semantics<parallel>, #tpu.dimension_semantics<parallel>], iteration_bounds = array<i64: 2, 2>, scalar_prefetch = 0 : i64, scratch_operands = 1 : i64, tpu.core_type = #tpu.core_type<tc>, window_params = [{transform_indices = @transform_0, window_bounds = array<i64: 1, 18, 18, 128>}, {pipeline_mode = #tpu.pipeline_mode<synchronous>, transform_indices = @transform_1, window_bounds = array<i64: 9, 128, 128>}, {pipeline_mode = #tpu.pipeline_mode<synchronous>, transform_indices = @transform_2, window_bounds = array<i64: 1, 128>}, {transform_indices = @transform_3, window_bounds = array<i64: 1, 8, 16, 128>}]} {
    %c8_i32 = arith.constant 8 : i32
    %0 = arith.muli %arg1, %c8_i32 : i32
    %1 = tpu.assume_multiple %0, 8 : i32
    %c0_i32 = arith.constant 0 : i32
    %2 = arith.addi %1, %c0_i32 : i32
    %c0 = arith.constant 0 : index
    %3 = arith.index_cast %2 : i32 to index
    %c0_0 = arith.constant 0 : index
    %c0_1 = arith.constant 0 : index
    %4 = vector.load %arg2[%c0, %3, %c0_0, %c0_1] : memref<1x18x18x128xf32, #tpu.memory_space<vmem>>, vector<1x8x16x128xf32>
    %5 = vector.shape_cast %4 : vector<1x8x16x128xf32> to vector<8x16x128xf32>
    %6 = vector.shape_cast %5 : vector<8x16x128xf32> to vector<128x128xf32>
    %c0_2 = arith.constant 0 : index
    %c0_3 = arith.constant 0 : index
    %c0_4 = arith.constant 0 : index
    %7 = vector.load %arg3[%c0_2, %c0_3, %c0_4] : memref<9x128x128xf32, #tpu.memory_space<vmem>>, vector<1x128x128xf32>
    %8 = vector.shape_cast %7 : vector<1x128x128xf32> to vector<128x128xf32>
    %cst = arith.constant dense<0.000000e+00> : vector<128x128xf32>
    %9 = tpu.matmul %6, %8, %cst {dimension_numbers = #tpu.dot_dimension_numbers<[1], [0], [0], [1], [0, 0, 1, 1], [], []>} : vector<128x128xf32>, vector<128x128xf32>, vector<128x128xf32> -> vector<128x128xf32>
    %c0_5 = arith.constant 0 : index
    %c0_6 = arith.constant 0 : index
    %10 = vector.load %arg6[%c0_5, %c0_6] : memref<128x128xf32, #tpu.memory_space<vmem>>, vector<128x128xf32>
    tpu.vector_store %arg6[%c0_5, %c0_6], %9 {strides = array<i32>} : memref<128x128xf32, #tpu.memory_space<vmem>>, vector<128x128xf32>,
    %c0_i32_7 = arith.constant 0 : i32
    %11 = arith.addi %1, %c0_i32_7 : i32
    %c0_8 = arith.constant 0 : index
    %12 = arith.index_cast %11 : i32 to index
    %c1 = arith.constant 1 : index
    %c0_9 = arith.constant 0 : index
    %13 = vector.load %arg2[%c0_8, %12, %c1, %c0_9] : memref<1x18x18x128xf32, #tpu.memory_space<vmem>>, vector<1x8x16x128xf32>
    %14 = vector.shape_cast %13 : vector<1x8x16x128xf32> to vector<8x16x128xf32>
    %15 = vector.shape_cast %14 : vector<8x16x128xf32> to vector<128x128xf32>
    %c1_10 = arith.constant 1 : index
    %c0_11 = arith.constant 0 : index
    %c0_12 = arith.constant 0 : index
    %16 = vector.load %arg3[%c1_10, %c0_11, %c0_12] : memref<9x128x128xf32, #tpu.memory_space<vmem>>, vector<1x128x128xf32>
    %17 = vector.shape_cast %16 : vector<1x128x128xf32> to vector<128x128xf32>
    %cst_13 = arith.constant dense<0.000000e+00> : vector<128x128xf32>
    %18 = tpu.matmul %15, %17, %cst_13 {dimension_numbers = #tpu.dot_dimension_numbers<[1], [0], [0], [1], [0, 0, 1, 1], [], []>} : vector<128x128xf32>, vector<128x128xf32>, vector<128x128xf32> -> vector<128x128xf32>
    %c0_14 = arith.constant 0 : index
    %c0_15 = arith.constant 0 : index
    %19 = vector.load %arg6[%c0_14, %c0_15] : memref<128x128xf32, #tpu.memory_space<vmem>>, vector<128x128xf32>
    %20 = arith.addf %19, %18 : vector<128x128xf32>
    %c0_16 = arith.constant 0 : index
    %c0_17 = arith.constant 0 : index
    %21 = vector.load %arg6[%c0_16, %c0_17] : memref<128x128xf32, #tpu.memory_space<vmem>>, vector<128x128xf32>
    tpu.vector_store %arg6[%c0_16, %c0_17], %20 {strides = array<i32>} : memref<128x128xf32, #tpu.memory_space<vmem>>, vector<128x128xf32>,
    %c0_i32_18 = arith.constant 0 : i32
    %22 = arith.addi %1, %c0_i32_18 : i32
    %c0_19 = arith.constant 0 : index
    %23 = arith.index_cast %22 : i32 to index
    %c2 = arith.constant 2 : index
    %c0_20 = arith.constant 0 : index
    %24 = vector.load %arg2[%c0_19, %23, %c2, %c0_20] : memref<1x18x18x128xf32, #tpu.memory_space<vmem>>, vector<1x8x16x128xf32>
    %25 = vector.shape_cast %24 : vector<1x8x16x128xf32> to vector<8x16x128xf32>
    %26 = vector.shape_cast %25 : vector<8x16x128xf32> to vector<128x128xf32>
    %c2_21 = arith.constant 2 : index
    %c0_22 = arith.constant 0 : index
    %c0_23 = arith.constant 0 : index
    %27 = vector.load %arg3[%c2_21, %c0_22, %c0_23] : memref<9x128x128xf32, #tpu.memory_space<vmem>>, vector<1x128x128xf32>
    %28 = vector.shape_cast %27 : vector<1x128x128xf32> to vector<128x128xf32>
    %cst_24 = arith.constant dense<0.000000e+00> : vector<128x128xf32>
    %29 = tpu.matmul %26, %28, %cst_24 {dimension_numbers = #tpu.dot_dimension_numbers<[1], [0], [0], [1], [0, 0, 1, 1], [], []>} : vector<128x128xf32>, vector<128x128xf32>, vector<128x128xf32> -> vector<128x128xf32>
    %c0_25 = arith.constant 0 : index
    %c0_26 = arith.constant 0 : index
    %30 = vector.load %arg6[%c0_25, %c0_26] : memref<128x128xf32, #tpu.memory_space<vmem>>, vector<128x128xf32>
    %31 = arith.addf %30, %29 : vector<128x128xf32>
    %c0_27 = arith.constant 0 : index
    %c0_28 = arith.constant 0 : index
    %32 = vector.load %arg6[%c0_27, %c0_28] : memref<128x128xf32, #tpu.memory_space<vmem>>, vector<128x128xf32>
    tpu.vector_store %arg6[%c0_27, %c0_28], %31 {strides = array<i32>} : memref<128x128xf32, #tpu.memory_space<vmem>>, vector<128x128xf32>,
    %c1_i32 = arith.constant 1 : i32
    %33 = arith.addi %1, %c1_i32 : i32
    %c0_29 = arith.constant 0 : index
    %34 = arith.index_cast %33 : i32 to index
    %c0_30 = arith.constant 0 : index
    %c0_31 = arith.constant 0 : index
    %35 = vector.load %arg2[%c0_29, %34, %c0_30, %c0_31] : memref<1x18x18x128xf32, #tpu.memory_space<vmem>>, vector<1x8x16x128xf32>
    %36 = vector.shape_cast %35 : vector<1x8x16x128xf32> to vector<8x16x128xf32>
    %37 = vector.shape_cast %36 : vector<8x16x128xf32> to vector<128x128xf32>
    %c3 = arith.constant 3 : index
    %c0_32 = arith.constant 0 : index
    %c0_33 = arith.constant 0 : index
    %38 = vector.load %arg3[%c3, %c0_32, %c0_33] : memref<9x128x128xf32, #tpu.memory_space<vmem>>, vector<1x128x128xf32>
    %39 = vector.shape_cast %38 : vector<1x128x128xf32> to vector<128x128xf32>
    %cst_34 = arith.constant dense<0.000000e+00> : vector<128x128xf32>
    %40 = tpu.matmul %37, %39, %cst_34 {dimension_numbers = #tpu.dot_dimension_numbers<[1], [0], [0], [1], [0, 0, 1, 1], [], []>} : vector<128x128xf32>, vector<128x128xf32>, vector<128x128xf32> -> vector<128x128xf32>
    %c0_35 = arith.constant 0 : index
    %c0_36 = arith.constant 0 : index
    %41 = vector.load %arg6[%c0_35, %c0_36] : memref<128x128xf32, #tpu.memory_space<vmem>>, vector<128x128xf32>
    %42 = arith.addf %41, %40 : vector<128x128xf32>
    %c0_37 = arith.constant 0 : index
    %c0_38 = arith.constant 0 : index
    %43 = vector.load %arg6[%c0_37, %c0_38] : memref<128x128xf32, #tpu.memory_space<vmem>>, vector<128x128xf32>
    tpu.vector_store %arg6[%c0_37, %c0_38], %42 {strides = array<i32>} : memref<128x128xf32, #tpu.memory_space<vmem>>, vector<128x128xf32>,
    %c1_i32_39 = arith.constant 1 : i32
    %44 = arith.addi %1, %c1_i32_39 : i32
    %c0_40 = arith.constant 0 : index
    %45 = arith.index_cast %44 : i32 to index
    %c1_41 = arith.constant 1 : index
    %c0_42 = arith.constant 0 : index
    %46 = vector.load %arg2[%c0_40, %45, %c1_41, %c0_42] : memref<1x18x18x128xf32, #tpu.memory_space<vmem>>, vector<1x8x16x128xf32>
    %47 = vector.shape_cast %46 : vector<1x8x16x128xf32> to vector<8x16x128xf32>
    %48 = vector.shape_cast %47 : vector<8x16x128xf32> to vector<128x128xf32>
    %c4 = arith.constant 4 : index
    %c0_43 = arith.constant 0 : index
    %c0_44 = arith.constant 0 : index
    %49 = vector.load %arg3[%c4, %c0_43, %c0_44] : memref<9x128x128xf32, #tpu.memory_space<vmem>>, vector<1x128x128xf32>
    %50 = vector.shape_cast %49 : vector<1x128x128xf32> to vector<128x128xf32>
    %cst_45 = arith.constant dense<0.000000e+00> : vector<128x128xf32>
    %51 = tpu.matmul %48, %50, %cst_45 {dimension_numbers = #tpu.dot_dimension_numbers<[1], [0], [0], [1], [0, 0, 1, 1], [], []>} : vector<128x128xf32>, vector<128x128xf32>, vector<128x128xf32> -> vector<128x128xf32>
    %c0_46 = arith.constant 0 : index
    %c0_47 = arith.constant 0 : index
    %52 = vector.load %arg6[%c0_46, %c0_47] : memref<128x128xf32, #tpu.memory_space<vmem>>, vector<128x128xf32>
    %53 = arith.addf %52, %51 : vector<128x128xf32>
    %c0_48 = arith.constant 0 : index
    %c0_49 = arith.constant 0 : index
    %54 = vector.load %arg6[%c0_48, %c0_49] : memref<128x128xf32, #tpu.memory_space<vmem>>, vector<128x128xf32>
    tpu.vector_store %arg6[%c0_48, %c0_49], %53 {strides = array<i32>} : memref<128x128xf32, #tpu.memory_space<vmem>>, vector<128x128xf32>,
    %c1_i32_50 = arith.constant 1 : i32
    %55 = arith.addi %1, %c1_i32_50 : i32
    %c0_51 = arith.constant 0 : index
    %56 = arith.index_cast %55 : i32 to index
    %c2_52 = arith.constant 2 : index
    %c0_53 = arith.constant 0 : index
    %57 = vector.load %arg2[%c0_51, %56, %c2_52, %c0_53] : memref<1x18x18x128xf32, #tpu.memory_space<vmem>>, vector<1x8x16x128xf32>
    %58 = vector.shape_cast %57 : vector<1x8x16x128xf32> to vector<8x16x128xf32>
    %59 = vector.shape_cast %58 : vector<8x16x128xf32> to vector<128x128xf32>
    %c5 = arith.constant 5 : index
    %c0_54 = arith.constant 0 : index
    %c0_55 = arith.constant 0 : index
    %60 = vector.load %arg3[%c5, %c0_54, %c0_55] : memref<9x128x128xf32, #tpu.memory_space<vmem>>, vector<1x128x128xf32>
    %61 = vector.shape_cast %60 : vector<1x128x128xf32> to vector<128x128xf32>
    %cst_56 = arith.constant dense<0.000000e+00> : vector<128x128xf32>
    %62 = tpu.matmul %59, %61, %cst_56 {dimension_numbers = #tpu.dot_dimension_numbers<[1], [0], [0], [1], [0, 0, 1, 1], [], []>} : vector<128x128xf32>, vector<128x128xf32>, vector<128x128xf32> -> vector<128x128xf32>
    %c0_57 = arith.constant 0 : index
    %c0_58 = arith.constant 0 : index
    %63 = vector.load %arg6[%c0_57, %c0_58] : memref<128x128xf32, #tpu.memory_space<vmem>>, vector<128x128xf32>
    %64 = arith.addf %63, %62 : vector<128x128xf32>
    %c0_59 = arith.constant 0 : index
    %c0_60 = arith.constant 0 : index
    %65 = vector.load %arg6[%c0_59, %c0_60] : memref<128x128xf32, #tpu.memory_space<vmem>>, vector<128x128xf32>
    tpu.vector_store %arg6[%c0_59, %c0_60], %64 {strides = array<i32>} : memref<128x128xf32, #tpu.memory_space<vmem>>, vector<128x128xf32>,
    %c2_i32 = arith.constant 2 : i32
    %66 = arith.addi %1, %c2_i32 : i32
    %c0_61 = arith.constant 0 : index
    %67 = arith.index_cast %66 : i32 to index
    %c0_62 = arith.constant 0 : index
    %c0_63 = arith.constant 0 : index
    %68 = vector.load %arg2[%c0_61, %67, %c0_62, %c0_63] : memref<1x18x18x128xf32, #tpu.memory_space<vmem>>, vector<1x8x16x128xf32>
    %69 = vector.shape_cast %68 : vector<1x8x16x128xf32> to vector<8x16x128xf32>
    %70 = vector.shape_cast %69 : vector<8x16x128xf32> to vector<128x128xf32>
    %c6 = arith.constant 6 : index
    %c0_64 = arith.constant 0 : index
    %c0_65 = arith.constant 0 : index
    %71 = vector.load %arg3[%c6, %c0_64, %c0_65] : memref<9x128x128xf32, #tpu.memory_space<vmem>>, vector<1x128x128xf32>
    %72 = vector.shape_cast %71 : vector<1x128x128xf32> to vector<128x128xf32>
    %cst_66 = arith.constant dense<0.000000e+00> : vector<128x128xf32>
    %73 = tpu.matmul %70, %72, %cst_66 {dimension_numbers = #tpu.dot_dimension_numbers<[1], [0], [0], [1], [0, 0, 1, 1], [], []>} : vector<128x128xf32>, vector<128x128xf32>, vector<128x128xf32> -> vector<128x128xf32>
    %c0_67 = arith.constant 0 : index
    %c0_68 = arith.constant 0 : index
    %74 = vector.load %arg6[%c0_67, %c0_68] : memref<128x128xf32, #tpu.memory_space<vmem>>, vector<128x128xf32>
    %75 = arith.addf %74, %73 : vector<128x128xf32>
    %c0_69 = arith.constant 0 : index
    %c0_70 = arith.constant 0 : index
    %76 = vector.load %arg6[%c0_69, %c0_70] : memref<128x128xf32, #tpu.memory_space<vmem>>, vector<128x128xf32>
    tpu.vector_store %arg6[%c0_69, %c0_70], %75 {strides = array<i32>} : memref<128x128xf32, #tpu.memory_space<vmem>>, vector<128x128xf32>,
    %c2_i32_71 = arith.constant 2 : i32
    %77 = arith.addi %1, %c2_i32_71 : i32
    %c0_72 = arith.constant 0 : index
    %78 = arith.index_cast %77 : i32 to index
    %c1_73 = arith.constant 1 : index
    %c0_74 = arith.constant 0 : index
    %79 = vector.load %arg2[%c0_72, %78, %c1_73, %c0_74] : memref<1x18x18x128xf32, #tpu.memory_space<vmem>>, vector<1x8x16x128xf32>
    %80 = vector.shape_cast %79 : vector<1x8x16x128xf32> to vector<8x16x128xf32>
    %81 = vector.shape_cast %80 : vector<8x16x128xf32> to vector<128x128xf32>
    %c7 = arith.constant 7 : index
    %c0_75 = arith.constant 0 : index
    %c0_76 = arith.constant 0 : index
    %82 = vector.load %arg3[%c7, %c0_75, %c0_76] : memref<9x128x128xf32, #tpu.memory_space<vmem>>, vector<1x128x128xf32>
    %83 = vector.shape_cast %82 : vector<1x128x128xf32> to vector<128x128xf32>
    %cst_77 = arith.constant dense<0.000000e+00> : vector<128x128xf32>
    %84 = tpu.matmul %81, %83, %cst_77 {dimension_numbers = #tpu.dot_dimension_numbers<[1], [0], [0], [1], [0, 0, 1, 1], [], []>} : vector<128x128xf32>, vector<128x128xf32>, vector<128x128xf32> -> vector<128x128xf32>
    %c0_78 = arith.constant 0 : index
    %c0_79 = arith.constant 0 : index
    %85 = vector.load %arg6[%c0_78, %c0_79] : memref<128x128xf32, #tpu.memory_space<vmem>>, vector<128x128xf32>
    %86 = arith.addf %85, %84 : vector<128x128xf32>
    %c0_80 = arith.constant 0 : index
    %c0_81 = arith.constant 0 : index
    %87 = vector.load %arg6[%c0_80, %c0_81] : memref<128x128xf32, #tpu.memory_space<vmem>>, vector<128x128xf32>
    tpu.vector_store %arg6[%c0_80, %c0_81], %86 {strides = array<i32>} : memref<128x128xf32, #tpu.memory_space<vmem>>, vector<128x128xf32>,
    %c2_i32_82 = arith.constant 2 : i32
    %88 = arith.addi %1, %c2_i32_82 : i32
    %c0_83 = arith.constant 0 : index
    %89 = arith.index_cast %88 : i32 to index
    %c2_84 = arith.constant 2 : index
    %c0_85 = arith.constant 0 : index
    %90 = vector.load %arg2[%c0_83, %89, %c2_84, %c0_85] : memref<1x18x18x128xf32, #tpu.memory_space<vmem>>, vector<1x8x16x128xf32>
    %91 = vector.shape_cast %90 : vector<1x8x16x128xf32> to vector<8x16x128xf32>
    %92 = vector.shape_cast %91 : vector<8x16x128xf32> to vector<128x128xf32>
    %c8 = arith.constant 8 : index
    %c0_86 = arith.constant 0 : index
    %c0_87 = arith.constant 0 : index
    %93 = vector.load %arg3[%c8, %c0_86, %c0_87] : memref<9x128x128xf32, #tpu.memory_space<vmem>>, vector<1x128x128xf32>
    %94 = vector.shape_cast %93 : vector<1x128x128xf32> to vector<128x128xf32>
    %cst_88 = arith.constant dense<0.000000e+00> : vector<128x128xf32>
    %95 = tpu.matmul %92, %94, %cst_88 {dimension_numbers = #tpu.dot_dimension_numbers<[1], [0], [0], [1], [0, 0, 1, 1], [], []>} : vector<128x128xf32>, vector<128x128xf32>, vector<128x128xf32> -> vector<128x128xf32>
    %c0_89 = arith.constant 0 : index
    %c0_90 = arith.constant 0 : index
    %96 = vector.load %arg6[%c0_89, %c0_90] : memref<128x128xf32, #tpu.memory_space<vmem>>, vector<128x128xf32>
    %97 = arith.addf %96, %95 : vector<128x128xf32>
    %c0_91 = arith.constant 0 : index
    %c0_92 = arith.constant 0 : index
    %98 = vector.load %arg6[%c0_91, %c0_92] : memref<128x128xf32, #tpu.memory_space<vmem>>, vector<128x128xf32>
    tpu.vector_store %arg6[%c0_91, %c0_92], %97 {strides = array<i32>} : memref<128x128xf32, #tpu.memory_space<vmem>>, vector<128x128xf32>,
    %c0_93 = arith.constant 0 : index
    %c0_94 = arith.constant 0 : index
    %99 = vector.load %arg6[%c0_93, %c0_94] : memref<128x128xf32, #tpu.memory_space<vmem>>, vector<128x128xf32>
    %c0_95 = arith.constant 0 : index
    %c0_96 = arith.constant 0 : index
    %100 = vector.load %arg4[%c0_95, %c0_96] : memref<1x128xf32, #tpu.memory_space<vmem>>, vector<1x128xf32>
    %101 = vector.broadcast %100 : vector<1x128xf32> to vector<128x128xf32>
    %102 = arith.addf %99, %101 : vector<128x128xf32>
    %cst_97 = arith.constant 0.000000e+00 : f32
    %103 = vector.broadcast %cst_97 : f32 to vector<128x128xf32>
    %104 = arith.maximumf %102, %103 : vector<128x128xf32>
    %105 = vector.shape_cast %104 : vector<128x128xf32> to vector<1x8x16x128xf32>
    %c0_98 = arith.constant 0 : index
    %c0_99 = arith.constant 0 : index
    %c0_100 = arith.constant 0 : index
    %c0_101 = arith.constant 0 : index
    %106 = vector.load %arg5[%c0_98, %c0_99, %c0_100, %c0_101] : memref<1x8x16x128xf32, #tpu.memory_space<vmem>>, vector<1x8x16x128xf32>
    tpu.vector_store %arg5[%c0_98, %c0_99, %c0_100, %c0_101], %105 {strides = array<i32>} : memref<1x8x16x128xf32, #tpu.memory_space<vmem>>, vector<1x8x16x128xf32>,
    return
  }
  func.func @transform_0(%arg0: i32, %arg1: i32) -> (i32, i32, i32, i32) {
    %c0_i32 = arith.constant 0 : i32
    %c0_i32_0 = arith.constant 0 : i32
    %c0_i32_1 = arith.constant 0 : i32
    %c0_i32_2 = arith.constant 0 : i32
    return %arg0, %c0_i32, %c0_i32_0, %c0_i32_1 : i32, i32, i32, i32
  }
  func.func @transform_1(%arg0: i32, %arg1: i32) -> (i32, i32, i32) {
    %c0_i32 = arith.constant 0 : i32
    %c0_i32_0 = arith.constant 0 : i32
    %c0_i32_1 = arith.constant 0 : i32
    %c0_i32_2 = arith.constant 0 : i32
    return %c0_i32, %c0_i32_0, %c0_i32_1 : i32, i32, i32
  }
  func.func @transform_2(%arg0: i32, %arg1: i32) -> (i32, i32) {
    %c0_i32 = arith.constant 0 : i32
    %c0_i32_0 = arith.constant 0 : i32
    %c0_i32_1 = arith.constant 0 : i32
    return %c0_i32, %c0_i32_0 : i32, i32
  }
  func.func @transform_3(%arg0: i32, %arg1: i32) -> (i32, i32, i32, i32) {
    %c0_i32 = arith.constant 0 : i32
    %c0_i32_0 = arith.constant 0 : i32
    %c0_i32_1 = arith.constant 0 : i32
    return %arg0, %arg1, %c0_i32, %c0_i32_0 : i32, i32, i32, i32
  }
}

</mosaic_0001>

<bundles_post_ra>
// kernel: tpu_custom_call.1
= control target key start
LH: loop header
LB: loop body
LE: loop exit
PB: predicated region body
PF: predicated region fallthrough
CT: control target
= control target key end

     0   :  { %8 = vsyncpa [#allocation4], 0  ;;  %s4954_s0 = inlined_call_operand.vmem [shape: f32[2,18,18,128], index: 0, kind: input, shape index: {}]   ;;  %s4955_s1 = inlined_call_operand.vmem [shape: f32[9,128,128], index: 1, kind: input, shape index: {}]   ;;  %s4956_s2 = inlined_call_operand.vmem [shape: f32[1,128], index: 2, kind: input, shape index: {}]   ;;  %s4957_s3 = inlined_call_operand.hbm [shape: f32[2,16,16,128], index: 3, kind: output, shape index: {}]  }
   0x1   :  { %10 = vsyncpa [#allocation4 + $0x1], 0  ;;  %s4031_s12 = smov 0   ;;  %s4033_s13 = smov 0  }
   0x2   :  { %s4035_s14 = smov 0   ;;  %s4037_s15 = smov 0  }
   0x3   :  { %s4039_s16 = smov 0   ;;  %s4041_s17 = smov 0  }
   0x4   :  { %s4043_s18 = smov 0   ;;  %s4045_s19 = smov 0  }
   0x5 LB: > { %s2368_s20 = sadd.s32 4294967295, %s4006_s19   ;;  %s2369_s21 = sadd.s32 4294967294, %s4006_s19   ;;  %s4006_s19 = sphi %s4045_s19, %s16_s19   ;;  %s4002_s18 = sphi %s4043_s18, %s4966_s18   ;;  %s3998_s17 = sphi %s4041_s17, %s4965_s17   ;;  %s3994_s16 = sphi %s4039_s16, %s4964_s16   ;;  %s3990_s15 = sphi %s4037_s15, %s4963_s15   ;;  %s3986_s14 = sphi %s4035_s14, %s4962_s14   ;;  %s3982_s13 = sphi %s4033_s13, %s4961_s13   ;;  %s3978_s12 = sphi %s4031_s12, %s4960_s12  }
   0x6   : > { %s25_s22 = sadd.s32 1, %s3998_s17  ;;  %s28_s23 = sadd.s32 1, %s4002_s18 }
   0x7   : > { %p26_p0 = scmp.ge.s32.totalorder %s25_s22, 2  ;;  %p115_p1 = scmp.ne.s32.totalorder %s3986_s14, %s3982_s13 }
   0x8   : > { %p116_p2 = scmp.eq.s32.totalorder %s2368_s20, 3  ;;  %p121_p5 = scmp.ne.s32.totalorder %s3982_s13, %s3978_s12 }
   0x9   : > { %s4968_s22 = smov (%p26_p0, %s25_s22), 0  ;;  %s4970_s23 = smov (!%p26_p0, %s28_s23), %s4002_s18 }
   0xa   : > { %s101_s24 = ssub.s32 %s3998_s17, %s4968_s22  ;;  %p4082_p3 = por %p116_p2, %p115_p1 }
   0xb   : > { %p30_p4 = scmp.ge.s32.totalorder %s4970_s23, 2  ;;  %p122_p6 = scmp.eq.s32.totalorder %s2369_s21, 3 }
   0xc   : > { %p2372_p7 = scmp.ge.s32.totalorder %s4006_s19, 1  ;;  %p154_p9 = scmp.lt.s32.totalorder %s4006_s19, 5 }
   0xd   : > { %s4972_s23 = smov (%p30_p4, %s4970_s23), 0  ;;  %p4091_p8 = por %p122_p6, %p121_p5 }
   0xe   : > { %s100_s27 = ssub.s32 %s4002_s18, %s4972_s23  ;;  %s105_s28 = sadd.s32 1, %s3986_s14 }
   0xf   : > { %s102_s29 = sor.u32 %s101_s24, %s100_s27  ;;  %p155_p10 = pnand %p2372_p7, %p154_p9 }
  0x10   : > { %p103_p11 = scmp.eq.s32.totalorder %s102_s29, 0  ;;  %v203_v0 = vld [vmem:[%s4955_s1] sm:$0xff] (!%p155_p10)  ;;  %v204_v1 = vld [vmem:[%s4955_s1 + $0x8] sm:$0xff] (!%p155_p10)  ;;  %p178_p12 = scmp.lt.s32.totalorder (!%p155_p10), %s3994_s16, 1  ;;  %v205_v5 = vld [vmem:[%s4955_s1 + $0x10] sm:$0xff] (!%p155_p10) }
  0x11   : > { %158 = sbr.rel (%p155_p10) target bundleno = 427 (0x1ab), region = 32  ;;  %v2459_v2 = vld [vmem:[%s4955_s1 + $0x200] sm:$0xff] (!%p155_p10)  ;;  %v3406_v3 = vpack.c.bf16 (!%p155_p10), %v204_v1, %v203_v0  ;;  %v2460_v4 = vld [vmem:[%s4955_s1 + $0x208] sm:$0xff] (!%p155_p10)  ;;  %v206_v6 = vld [vmem:[%s4955_s1 + $0x18] sm:$0xff] (!%p155_p10)  ;;  %s2613_s29 = sshll.u32 (!%p155_p10), %s3990_s15, 4 }
  0x12   : > { %s4100_s30 = scalar_select %p103_p11, %s3986_s14, %s105_s28  }
  0x13   : > { %v3534_v7 = vpack.c.bf16 (!%p155_p10), %v2460_v4, %v2459_v2  ;;  %v3410_v8 = vpack.c.bf16 (!%p155_p10), %v206_v6, %v205_v5  ;;  %v2461_v9 = vld [vmem:[%s4955_s1 + $0x210] sm:$0xff] (!%p155_p10)  ;;  %v2462_v10 = vld [vmem:[%s4955_s1 + $0x218] sm:$0xff] (!%p155_p10)  ;;  %v207_v11 = vld [vmem:[%s4955_s1 + $0x20] sm:$0xff] (!%p155_p10)  ;;  %3407 = vmatprep.subr.bf16.mxu1 (!%p155_p10), %v3406_v3  ;;  %s2376_s27 = smul.u32 (!%p155_p10), 192, %s3990_s15 }
  0x14   : > { %v3538_v12 = vpack.c.bf16 (!%p155_p10), %v2462_v10, %v2461_v9  ;;  %v208_v13 = vld [vmem:[%s4955_s1 + $0x28] sm:$0xff] (!%p155_p10)  ;;  %v2463_v14 = vld [vmem:[%s4955_s1 + $0x220] sm:$0xff] (!%p155_p10)  ;;  %3409 = vmatpush3.bf16.msra.mxu1 (!%p155_p10), %v3406_v3  ;;  %v209_v18 = vld [vmem:[%s4955_s1 + $0x30] sm:$0xff] (!%p155_p10) }
  0x15   : > { %v2464_v15 = vld [vmem:[%s4955_s1 + $0x228] sm:$0xff] (!%p155_p10)  ;;  %3535 = vmatprep.subr.bf16.mxu0 (!%p155_p10), %v3534_v7  ;;  %3411 = vmatprep.subr.bf16.mxu1 (!%p155_p10), %v3410_v8  ;;  %v3414_v16 = vpack.c.bf16 (!%p155_p10), %v208_v13, %v207_v11  ;;  %v210_v19 = vld [vmem:[%s4955_s1 + $0x38] sm:$0xff] (!%p155_p10)  ;;  %v2465_v20 = vld [vmem:[%s4955_s1 + $0x230] sm:$0xff] (!%p155_p10) }
  0x16   : > { %3537 = vmatpush3.bf16.msra.mxu0 (!%p155_p10), %v3534_v7  ;;  %v3542_v17 = vpack.c.bf16 (!%p155_p10), %v2464_v15, %v2463_v14  ;;  %v2466_v21 = vld [vmem:[%s4955_s1 + $0x238] sm:$0xff] (!%p155_p10)  ;;  %v3418_v22 = vpack.c.bf16 (!%p155_p10), %v210_v19, %v209_v18  ;;  %v211_v24 = vld [vmem:[%s4955_s1 + $0x40] sm:$0xff] (!%p155_p10)  ;;  %v212_v25 = vld [vmem:[%s4955_s1 + $0x48] sm:$0xff] (!%p155_p10) }
  0x17   : > { %3539 = vmatprep.subr.bf16.mxu0 (!%p155_p10), %v3538_v12  ;;  %v3546_v23 = vpack.c.bf16 (!%p155_p10), %v2466_v21, %v2465_v20  ;;  %v2467_v27 = vld [vmem:[%s4955_s1 + $0x240] sm:$0xff] (!%p155_p10)  ;;  %v2468_v28 = vld [vmem:[%s4955_s1 + $0x248] sm:$0xff] (!%p155_p10)  ;;  %v3422_v30 = vpack.c.bf16 (!%p155_p10), %v212_v25, %v211_v24  ;;  %v213_v32 = vld [vmem:[%s4955_s1 + $0x50] sm:$0xff] (!%p155_p10) }
  0x18   : > { %s179_s8 = scalar_select %p178_p12, %s3994_s16, 1  ;;  %3413 = vmatpush3.bf16.msra.mxu1 %v3410_v8  ;;  %v3550_v31 = vpack.c.bf16 %v2468_v28, %v2467_v27  ;;  %v214_v33 = vld [vmem:[%s4955_s1 + $0x58] sm:$0xff]  ;;  %v2469_v34 = vld [vmem:[%s4955_s1 + $0x250] sm:$0xff]  ;;  %v215_v38 = vld [vmem:[%s4955_s1 + $0x60] sm:$0xff] }
  0x19   : > { %3415 = vmatprep.subr.bf16.mxu1 %v3414_v16  ;;  %v2470_v35 = vld [vmem:[%s4955_s1 + $0x258] sm:$0xff]  ;;  %v3426_v36 = vpack.c.bf16 %v214_v33, %v213_v32  ;;  %v216_v39 = vld [vmem:[%s4955_s1 + $0x68] sm:$0xff]  ;;  %v2471_v40 = vld [vmem:[%s4955_s1 + $0x260] sm:$0xff] }
  0x1a   : > { %s3838_s28 = smul.u32 432, %s179_s8  ;;  %3541 = vmatpush3.bf16.msra.mxu0 %v3538_v12  ;;  %v3554_v37 = vpack.c.bf16 %v2470_v35, %v2469_v34  ;;  %v2472_v41 = vld [vmem:[%s4955_s1 + $0x268] sm:$0xff]  ;;  %v3430_v42 = vpack.c.bf16 %v216_v39, %v215_v38  ;;  %v217_v44 = vld [vmem:[%s4955_s1 + $0x70] sm:$0xff]  ;;  %v218_v45 = vld [vmem:[%s4955_s1 + $0x78] sm:$0xff] }
  0x1b   : > { %3543 = vmatprep.subr.bf16.mxu0 %v3542_v17  ;;  %v3558_v43 = vpack.c.bf16 %v2472_v41, %v2471_v40  ;;  %v2473_v46 = vld [vmem:[%s4955_s1 + $0x270] sm:$0xff]  ;;  %v2474_v47 = vld [vmem:[%s4955_s1 + $0x278] sm:$0xff]  ;;  %v3434_v48 = vpack.c.bf16 %v218_v45, %v217_v44  ;;  %v2377_v50 = vld [vmem:[%s4955_s1 + $0x80] sm:$0xff] }
  0x1c   : > { %s182_s10 = scalar_lea.vmem %s4954_s0, %s3838_s28  ;;  %3417 = vmatpush3.bf16.msra.mxu1 %v3414_v16  ;;  %v3562_v49 = vpack.c.bf16 %v2474_v47, %v2473_v46  ;;  %v2378_v51 = vld [vmem:[%s4955_s1 + $0x88] sm:$0xff]  ;;  %v2491_v52 = vld [vmem:[%s4955_s1 + $0x280] sm:$0xff]  ;;  %v2379_v56 = vld [vmem:[%s4955_s1 + $0x90] sm:$0xff]  ;;  %s2609_s28 = sshll.u32 %s3994_s16, 5 }
  0x1d   : > { %s4156_s24 = scalar_lea.vmem %s182_s10, %s2376_s27  ;;  %3419 = vmatprep.subr.bf16.mxu1 %v3418_v22  ;;  %v2492_v53 = vld [vmem:[%s4955_s1 + $0x288] sm:$0xff]  ;;  %v3438_v54 = vpack.c.bf16 %v2378_v51, %v2377_v50  ;;  %v2380_v57 = vld [vmem:[%s4955_s1 + $0x98] sm:$0xff]  ;;  %v2493_v59 = vld [vmem:[%s4955_s1 + $0x290] sm:$0xff]  ;;  %s2279_s15 = sadd.s32 %s2613_s29, %s2609_s28 }
  0x1e   : > { %v187_v26 = vld [vmem:[%s4156_s24] sm:$0xff]  ;;  %3545 = vmatpush3.bf16.msra.mxu0 %v3542_v17  ;;  %v3566_v55 = vpack.c.bf16 %v2492_v53, %v2491_v52  ;;  %v188_v58 = vld [vmem:[%s4156_s24 + $0x8] sm:$0xff]  ;;  %v2494_v60 = vld [vmem:[%s4955_s1 + $0x298] sm:$0xff]  ;;  %v3442_v63 = vpack.c.bf16 %v2380_v57, %v2379_v56  ;;  %s2610_s16 = sshll.u32 %s2279_s15, 7  ;;  %s4008_s10 = smov [#allocation3]  }
  0x1f   : > { %2934 = vmatprep.mubr.f32.mxu1 %v187_v26  ;;  %v4172_v29 = vld [vmem:[%s4156_s24 + $0x19] sm:$0xff]  ;;  %3547 = vmatprep.subr.bf16.mxu0 %v3546_v23  ;;  %v4237_v61 = vld [vmem:[%s4156_s24 + $0x21] sm:$0xff]  ;;  %v4243_v0 = vld [vmem:[%s4156_s24 + $0x31] sm:$0xff]  ;;  %v3570_v1 = vpack.c.bf16 %v2494_v60, %v2493_v59  ;;  %s4892_s27 = scalar_lea.hbm %s4957_s3, %s2610_s16  ;;  %s3916_s11 = sshll.u32 %s4008_s10, 4  ;;  %s3917_s11 = int_to_ptr.vmem [resolvable:$false] %s3916_s11 }
  0x20   : > { %3158 = vmatprep.mubr.f32.mxu0 %v4172_v29  ;;  %3421 = vmatpush3.bf16.msra.mxu1 %v3418_v22  ;;  %v4240_v62 = vld [vmem:[%s4156_s24 + $0x18] sm:$0xff]  ;;  %v2381_v2 = vld [vmem:[%s4955_s1 + $0xa0] sm:$0xff]  ;;  %v2382_v3 = vld [vmem:[%s4955_s1 + $0xa8] sm:$0xff]  ;;  %s3918_s20 = scalar_lea.vmem %s3917_s11, 4096 }
  0x21   : > { %3423 = vmatprep.subr.bf16.mxu1 %v3422_v30  ;;  %v4253_v4 = vld [vmem:[%s4156_s24 + $0x20] sm:$0xff]  ;;  %v2496_v6 = vld [vmem:[%s4955_s1 + $0x2a8] sm:$0xff]  ;;  %v4267_v8 = vld [vmem:[%s4156_s24 + $0x30] sm:$0xff]  ;;  %v3446_v9 = vpack.c.bf16 %v2382_v3, %v2381_v2 }
  0x22   : > { %3549 = vmatpush3.bf16.msra.mxu0 %v3546_v23  ;;  %v2495_v5 = vld [vmem:[%s4955_s1 + $0x2a0] sm:$0xff]  ;;  %v4271_v10 = vld [vmem:[%s4156_s24 + $0x49] sm:$0xff]  ;;  %v2384_v13 = vld [vmem:[%s4955_s1 + $0xb8] sm:$0xff] }
  0x23   : > { %3551 = vmatprep.subr.bf16.mxu0 %v3550_v31  ;;  %v4263_v7 = vld [vmem:[%s4156_s24 + $0x39] sm:$0xff]  ;;  %v3574_v11 = vpack.c.bf16 %v2496_v6, %v2495_v5  ;;  %v2383_v12 = vld [vmem:[%s4955_s1 + $0xb0] sm:$0xff]  ;;  %v4295_v18 = vld [vmem:[%s4156_s24 + $0x48] sm:$0xff] }
  0x24   : > { %3425 = vmatpush3.bf16.msra.mxu1 %v3422_v30  ;;  %v4281_v14 = vld [vmem:[%s4156_s24 + $0x38] sm:$0xff]  ;;  %v2497_v15 = vld [vmem:[%s4955_s1 + $0x2b0] sm:$0xff]  ;;  %v3450_v19 = vpack.c.bf16 %v2384_v13, %v2383_v12  ;;  %v4299_v20 = vld [vmem:[%s4156_s24 + $0x61] sm:$0xff] }
  0x25   : > { %3427 = vmatprep.subr.bf16.mxu1 %v3426_v36  ;;  %v2498_v16 = vld [vmem:[%s4955_s1 + $0x2b8] sm:$0xff]  ;;  %v2385_v22 = vld [vmem:[%s4955_s1 + $0xc0] sm:$0xff]  ;;  %v2386_v23 = vld [vmem:[%s4955_s1 + $0xc8] sm:$0xff] }
  0x26   : > { %3553 = vmatpush3.bf16.msra.mxu0 %v3550_v31  ;;  %v4291_v17 = vld [vmem:[%s4156_s24 + $0x51] sm:$0xff]  ;;  %v3578_v21 = vpack.c.bf16 %v2498_v16, %v2497_v15  ;;  %v2499_v25 = vld [vmem:[%s4955_s1 + $0x2c0] sm:$0xff]  ;;  %v2500_v26 = vld [vmem:[%s4955_s1 + $0x2c8] sm:$0xff]  ;;  %v3454_v30 = vpack.c.bf16 %v2386_v23, %v2385_v22 }
  0x27   : > { %3555 = vmatprep.subr.bf16.mxu0 %v3554_v37  ;;  %v4309_v24 = vld [vmem:[%s4156_s24 + $0x50] sm:$0xff]  ;;  %v4323_v28 = vld [vmem:[%s4156_s24 + $0x60] sm:$0xff]  ;;  %v3582_v32 = vpack.c.bf16 %v2500_v26, %v2499_v25  ;;  %v2388_v34 = vld [vmem:[%s4955_s1 + $0xd8] sm:$0xff] }
  0x28   : > { %3429 = vmatpush3.bf16.msra.mxu1 %v3426_v36  ;;  %v4319_v27 = vld [vmem:[%s4156_s24 + $0x69] sm:$0xff]  ;;  %v4327_v31 = vld [vmem:[%s4156_s24 + $0x79] sm:$0xff]  ;;  %v4347_v38 = vld [vmem:[%s4156_s24 + $0x81] sm:$0xff] }
  0x29   : > { %3431 = vmatprep.subr.bf16.mxu1 %v3430_v42  ;;  %v2387_v33 = vld [vmem:[%s4955_s1 + $0xd0] sm:$0xff]  ;;  %v4337_v35 = vld [vmem:[%s4156_s24 + $0x68] sm:$0xff]  ;;  %v4351_v39 = vld [vmem:[%s4156_s24 + $0x78] sm:$0xff] }
  0x2a   : > { %3557 = vmatpush3.bf16.msra.mxu0 %v3554_v37  ;;  %v2501_v36 = vld [vmem:[%s4955_s1 + $0x2d0] sm:$0xff]  ;;  %v2502_v37 = vld [vmem:[%s4955_s1 + $0x2d8] sm:$0xff]  ;;  %v3458_v40 = vpack.c.bf16 %v2388_v34, %v2387_v33  ;;  %v2390_v44 = vld [vmem:[%s4955_s1 + $0xe8] sm:$0xff] }
  0x2b   : > { %3559 = vmatprep.subr.bf16.mxu0 %v3558_v43  ;;  %v4355_v41 = vld [vmem:[%s4156_s24 + $0x91] sm:$0xff]  ;;  %v4365_v45 = vld [vmem:[%s4156_s24 + $0x80] sm:$0xff]  ;;  %v2504_v47 = vld [vmem:[%s4955_s1 + $0x2e8] sm:$0xff] }
  0x2c   : > { %3433 = vmatpush3.bf16.msra.mxu1 %v3430_v42  ;;  %v3586_v42 = vpack.c.bf16 %v2502_v37, %v2501_v36  ;;  %v2503_v46 = vld [vmem:[%s4955_s1 + $0x2e0] sm:$0xff]  ;;  %v4383_v51 = vld [vmem:[%s4156_s24 + $0xa9] sm:$0xff]  ;;  %v2506_v57 = vld [vmem:[%s4955_s1 + $0x2f8] sm:$0xff] }
  0x2d   : > { %3435 = vmatprep.subr.bf16.mxu1 %v3434_v48  ;;  %v3590_v52 = vpack.c.bf16 %v2504_v47, %v2503_v46  ;;  %v2391_v53 = vld [vmem:[%s4955_s1 + $0xf0] sm:$0xff]  ;;  %v4407_v59 = vld [vmem:[%s4156_s24 + $0xa8] sm:$0xff]  ;;  %v2393_v2 = vld [vmem:[%s4955_s1 + $0x100] sm:$0xff] }
  0x2e   : > { %3561 = vmatpush3.bf16.msra.mxu0 %v3558_v43  ;;  %v2389_v43 = vld [vmem:[%s4955_s1 + $0xe0] sm:$0xff]  ;;  %v2505_v56 = vld [vmem:[%s4955_s1 + $0x2f0] sm:$0xff]  ;;  %v2394_v3 = vld [vmem:[%s4955_s1 + $0x108] sm:$0xff] }
  0x2f   : > { %3563 = vmatprep.subr.bf16.mxu0 %v3562_v49  ;;  %v3462_v50 = vpack.c.bf16 %v2390_v44, %v2389_v43  ;;  %v4421_v5 = vld [vmem:[%s4156_s24 + $0xb0] sm:$0xff]  ;;  %v2525_v6 = vld [vmem:[%s4955_s1 + $0x300] sm:$0xff]  ;;  %v3470_v13 = vpack.c.bf16 %v2394_v3, %v2393_v2  ;;  %v2528_v25 = vld [vmem:[%s4955_s1 + $0x318] sm:$0xff] }
  0x30   : > { %3437 = vmatpush3.bf16.msra.mxu1 %v3434_v48  ;;  %v4375_v48 = vld [vmem:[%s4156_s24 + $0x99] sm:$0xff]  ;;  %v380_v12 = vld [vmem:[%s4156_s24 + $0x1] sm:$0xff]  ;;  %v381_v22 = vld [vmem:[%s4156_s24 + $0x9] sm:$0xff] }
  0x31   : > { %3439 = vmatprep.subr.bf16.mxu1 %v3438_v54  ;;  %v4437_v15 = vld [vmem:[%s4156_s24 + $0x1a] sm:$0xff]  ;;  %v2527_v23 = vld [vmem:[%s4955_s1 + $0x310] sm:$0xff]  ;;  %v4454_v26 = vld [vmem:[%s4156_s24 + $0x22] sm:$0xff] }
  0x32   : > { %3565 = vmatpush3.bf16.msra.mxu0 %v3562_v49  ;;  %v4379_v49 = vld [vmem:[%s4156_s24 + $0x90] sm:$0xff]  ;;  %v3602_v33 = vpack.c.bf16 %v2528_v25, %v2527_v23  ;;  %v2397_v34 = vld [vmem:[%s4955_s1 + $0x120] sm:$0xff]  ;;  %v2398_v36 = vld [vmem:[%s4955_s1 + $0x128] sm:$0xff] }
  0x33   : > { %3567 = vmatprep.subr.bf16.mxu0 %v3566_v55  ;;  %2935 = vmatmul.mubr.f32.vlgmr.msra.gmra.mrb[0].mxu1 %v188_v58  ;;  %v4403_v58 = vld [vmem:[%s4156_s24 + $0xb1] sm:$0xff]  ;;  %v2529_v37 = vld [vmem:[%s4955_s1 + $0x320] sm:$0xff]  ;;  %v3478_v43 = vpack.c.bf16 %v2398_v36, %v2397_v34  ;;  %v2534_v2 = vld [vmem:[%s4955_s1 + $0x348] sm:$0xff] }
  0x34   : > { %3441 = vmatpush3.bf16.msra.mxu1 %v3438_v54  ;;  %2937 = vmatprep.mubr.f32.mxu1 %v4240_v62  ;;  %v2392_v54 = vld [vmem:[%s4955_s1 + $0xf8] sm:$0xff]  ;;  %v4480_v44 = vld [vmem:[%s4156_s24 + $0x4a] sm:$0xff]  ;;  %v2537_v36 = vld [vmem:[%s4955_s1 + $0x360] sm:$0xff] }
  0x35   : > { %3159 = vmatmul.mubr.f32.vlgmr.msra.gmra.mrb[0].mxu0 %v4237_v61  ;;  %3443 = vmatprep.subr.bf16.mxu1 %v3442_v63  ;;  %v3466_v60 = vpack.c.bf16 %v2392_v54, %v2391_v53  ;;  %v2399_v47 = vld [vmem:[%s4955_s1 + $0x130] sm:$0xff]  ;;  %v4502_v54 = vld [vmem:[%s4156_s24 + $0x62] sm:$0xff] }
  0x36   : > { %3569 = vmatpush3.bf16.msra.mxu0 %v3566_v55  ;;  %3161 = vmatprep.mubr.f32.mxu0 %v4243_v0  ;;  %v4393_v55 = vld [vmem:[%s4156_s24 + $0x98] sm:$0xff]  ;;  %v4519_v3 = vld [vmem:[%s4156_s24 + $0x6a] sm:$0xff] }
  0x37   : > { %2938 = vmatmul.mubr.f32.gmra.mrb[2].mxu1 %v4253_v4  ;;  %3571 = vmatprep.subr.bf16.mxu0 %v3570_v1  ;;  %v4546_v25 = vld [vmem:[%s4156_s24 + $0x92] sm:$0xff]  ;;  %v2406_v34 = vld [vmem:[%s4955_s1 + $0x168] sm:$0xff] }
  0x38   : > { %3445 = vmatpush3.bf16.msra.mxu1 %v3442_v63  ;;  %2940 = vmatprep.mubr.f32.mxu1 %v4267_v8  ;;  %v4411_v63 = vld [vmem:[%s4156_s24 + $0xc1] sm:$0xff] }
  0x39   : > { %3162 = vmatmul.mubr.f32.gmra.mrb[2].mxu0 %v4263_v7  ;;  %3447 = vmatprep.subr.bf16.mxu1 %v3446_v9 }
  0x3a   : > { %3573 = vmatpush3.bf16.msra.mxu0 %v3570_v1  ;;  %3164 = vmatprep.mubr.f32.mxu0 %v4271_v10  ;;  %v3594_v1 = vpack.c.bf16 %v2506_v57, %v2505_v56  ;;  %v2401_v57 = vld [vmem:[%s4955_s1 + $0x140] sm:$0xff] }
  0x3b   : > { %2941 = vmatmul.mubr.f32.gmra.mrb[4].mxu1 %v4281_v14  ;;  %3575 = vmatprep.subr.bf16.mxu0 %v3574_v11 }
  0x3c   : > { %3449 = vmatpush3.bf16.msra.mxu1 %v3446_v9  ;;  %2943 = vmatprep.mubr.f32.mxu1 %v4295_v18  ;;  %v2526_v9 = vld [vmem:[%s4955_s1 + $0x308] sm:$0xff] }
  0x3d   : > { %3165 = vmatmul.mubr.f32.gmra.mrb[4].mxu0 %v4291_v17  ;;  %3451 = vmatprep.subr.bf16.mxu1 %v3450_v19  ;;  %v3598_v16 = vpack.c.bf16 %v2526_v9, %v2525_v6  ;;  %v4524_v9 = vld [vmem:[%s4156_s24 + $0x7a] sm:$0xff] }
  0x3e   : > { %3577 = vmatpush3.bf16.msra.mxu0 %v3574_v11  ;;  %3167 = vmatprep.mubr.f32.mxu0 %v4299_v20  ;;  %v4431_v11 = vld [vmem:[%s4156_s24 + $0xc9] sm:$0xff] }
  0x3f   : > { %2944 = vmatmul.mubr.f32.gmra.mrb[6].mxu1 %v4309_v24  ;;  %3579 = vmatprep.subr.bf16.mxu0 %v3578_v21 }
  0x40   : > { %3453 = vmatpush3.bf16.msra.mxu1 %v3450_v19  ;;  %2946 = vmatprep.mubr.f32.mxu1 %v4323_v28  ;;  %v2395_v19 = vld [vmem:[%s4955_s1 + $0x110] sm:$0xff] }
  0x41   : > { %3168 = vmatmul.mubr.f32.gmra.mrb[6].mxu0 %v4319_v27  ;;  %3455 = vmatprep.subr.bf16.mxu1 %v3454_v30 }
  0x42   : > { %3581 = vmatpush3.bf16.msra.mxu0 %v3578_v21  ;;  %3170 = vmatprep.mubr.f32.mxu0 %v4327_v31  ;;  %v2396_v21 = vld [vmem:[%s4955_s1 + $0x118] sm:$0xff] }
  0x43   : > { %2947 = vmatmul.mubr.f32.gmra.mrb[8].mxu1 %v4337_v35  ;;  %3583 = vmatprep.subr.bf16.mxu0 %v3582_v32 }
  0x44   : > { %3457 = vmatpush3.bf16.msra.mxu1 %v3454_v30  ;;  %2949 = vmatprep.mubr.f32.mxu1 %v4351_v39  ;;  %v3474_v30 = vpack.c.bf16 %v2396_v21, %v2395_v19  ;;  %v2535_v19 = vld [vmem:[%s4955_s1 + $0x350] sm:$0xff]  ;;  %v2536_v21 = vld [vmem:[%s4955_s1 + $0x358] sm:$0xff] }
  0x45   : > { %3171 = vmatmul.mubr.f32.gmra.mrb[8].mxu0 %v4347_v38  ;;  %3459 = vmatprep.subr.bf16.mxu1 %v3458_v40 }
  0x46   : > { %3585 = vmatpush3.bf16.msra.mxu0 %v3582_v32  ;;  %3173 = vmatprep.mubr.f32.mxu0 %v4355_v41  ;;  %v4458_v32 = vld [vmem:[%s4156_s24 + $0x32] sm:$0xff] }
  0x47   : > { %2950 = vmatmul.mubr.f32.gmra.mrb[10].mxu1 %v4365_v45  ;;  %3587 = vmatprep.subr.bf16.mxu0 %v3586_v42 }
  0x48   : > { %3461 = vmatpush3.bf16.msra.mxu1 %v3458_v40  ;;  %2952 = vmatprep.mubr.f32.mxu1 %v4379_v49  ;;  %v2530_v40 = vld [vmem:[%s4955_s1 + $0x328] sm:$0xff] }
  0x49   : > { %3174 = vmatmul.mubr.f32.gmra.mrb[10].mxu0 %v4375_v48  ;;  %3463 = vmatprep.subr.bf16.mxu1 %v3462_v50  ;;  %v3606_v46 = vpack.c.bf16 %v2530_v40, %v2529_v37  ;;  %v2538_v37 = vld [vmem:[%s4955_s1 + $0x368] sm:$0xff]  ;;  %v4563_v40 = vld [vmem:[%s4156_s24 + $0x9a] sm:$0xff] }
  0x4a   : > { %3589 = vmatpush3.bf16.msra.mxu0 %v3586_v42  ;;  %3176 = vmatprep.mubr.f32.mxu0 %v4383_v51  ;;  %v4475_v42 = vld [vmem:[%s4156_s24 + $0x3a] sm:$0xff] }
  0x4b   : > { %2953 = vmatmul.mubr.f32.gmra.mrb[12].mxu1 %v4393_v55  ;;  %3591 = vmatprep.subr.bf16.mxu0 %v3590_v52 }
  0x4c   : > { %3465 = vmatpush3.bf16.msra.mxu1 %v3462_v50  ;;  %2955 = vmatprep.mubr.f32.mxu1 %v4407_v59  ;;  %v2532_v50 = vld [vmem:[%s4955_s1 + $0x338] sm:$0xff] }
  0x4d   : > { %3177 = vmatmul.mubr.f32.gmra.mrb[12].mxu0 %v4403_v58  ;;  %3467 = vmatprep.subr.bf16.mxu1 %v3466_v60 }
  0x4e   : > { %3593 = vmatpush3.bf16.msra.mxu0 %v3590_v52  ;;  %3179 = vmatprep.mubr.f32.mxu0 %v4411_v63  ;;  %v4497_v52 = vld [vmem:[%s4156_s24 + $0x52] sm:$0xff] }
  0x4f   : > { %2956 = vmatmul.mubr.f32.gmra.mrb[14].mxu1 %v4421_v5  ;;  %3595 = vmatprep.subr.bf16.mxu0 %v3594_v1 }
  0x50   : > { %3469 = vmatpush3.bf16.msra.mxu1 %v3466_v60  ;;  %2990 = vmatprep.mubr.f32.mxu1 %v380_v12  ;;  %v2402_v60 = vld [vmem:[%s4955_s1 + $0x148] sm:$0xff] }
  0x51   : > { %3180 = vmatmul.mubr.f32.gmra.mrb[14].mxu0 %v4431_v11  ;;  %3471 = vmatprep.subr.bf16.mxu1 %v3470_v13  ;;  %v3486_v6 = vpack.c.bf16 %v2402_v60, %v2401_v57  ;;  %v4590_v60 = vld [vmem:[%s4156_s24 + $0xc2] sm:$0xff] }
  0x52   : > { %3597 = vmatpush3.bf16.msra.mxu0 %v3594_v1  ;;  %3214 = vmatprep.mubr.f32.mxu0 %v4437_v15  ;;  %v2533_v1 = vld [vmem:[%s4955_s1 + $0x340] sm:$0xff] }
  0x53   : > { %2991 = vmatmul.mubr.f32.vlgmr.msra.gmra.mrb[0].mxu1 %v381_v22  ;;  %3599 = vmatprep.subr.bf16.mxu0 %v3598_v16  ;;  %v3614_v12 = vpack.c.bf16 %v2534_v2, %v2533_v1  ;;  %v4541_v22 = vld [vmem:[%s4156_s24 + $0x82] sm:$0xff] }
  0x54   : > { %3473 = vmatpush3.bf16.msra.mxu1 %v3470_v13  ;;  %2993 = vmatprep.mubr.f32.mxu1 %v4172_v29  ;;  %v2400_v29 = vld [vmem:[%s4955_s1 + $0x138] sm:$0xff]  ;;  %v2403_v13 = vld [vmem:[%s4955_s1 + $0x150] sm:$0xff]  ;;  %v2427_v2 = vld [vmem:[%s4955_s1 + $0x180] sm:$0xff] }
  0x55   : > { %3215 = vmatmul.mubr.f32.vlgmr.msra.gmra.mrb[0].mxu0 %v4454_v26  ;;  %3475 = vmatprep.subr.bf16.mxu1 %v3474_v30  ;;  %v3482_v53 = vpack.c.bf16 %v2400_v29, %v2399_v47  ;;  %v3622_v47 = vpack.c.bf16 %v2538_v37, %v2537_v36  ;;  %v2407_v29 = vld [vmem:[%s4955_s1 + $0x170] sm:$0xff]  ;;  %v2560_v37 = vld [vmem:[%s4955_s1 + $0x398] sm:$0xff] }
  0x56   : > { %3601 = vmatpush3.bf16.msra.mxu0 %v3598_v16  ;;  %3217 = vmatprep.mubr.f32.mxu0 %v4458_v32  ;;  %v2404_v16 = vld [vmem:[%s4955_s1 + $0x158] sm:$0xff]  ;;  %v2559_v36 = vld [vmem:[%s4955_s1 + $0x390] sm:$0xff] }
  0x57   : > { %2994 = vmatmul.mubr.f32.gmra.mrb[2].mxu1 %v4237_v61  ;;  %3603 = vmatprep.subr.bf16.mxu0 %v3602_v33  ;;  %v2531_v61 = vld [vmem:[%s4955_s1 + $0x330] sm:$0xff]  ;;  %v3490_v23 = vpack.c.bf16 %v2404_v16, %v2403_v13  ;;  %v2558_v13 = vld [vmem:[%s4955_s1 + $0x388] sm:$0xff] }
  0x58   : > { %3477 = vmatpush3.bf16.msra.mxu1 %v3474_v30  ;;  %2996 = vmatprep.mubr.f32.mxu1 %v4243_v0  ;;  %v3610_v56 = vpack.c.bf16 %v2532_v50, %v2531_v61  ;;  %v3618_v30 = vpack.c.bf16 %v2536_v21, %v2535_v19  ;;  %v2408_v61 = vld [vmem:[%s4955_s1 + $0x178] sm:$0xff]  ;;  %v2539_v50 = vld [vmem:[%s4955_s1 + $0x370] sm:$0xff]  ;;  %v606_v19 = vld [vmem:[%s4156_s24 + $0x2] sm:$0xff] }
  0x59   : > { %3218 = vmatmul.mubr.f32.gmra.mrb[2].mxu0 %v4475_v42  ;;  %3479 = vmatprep.subr.bf16.mxu1 %v3478_v43  ;;  %v3498_v57 = vpack.c.bf16 %v2408_v61, %v2407_v29  ;;  %v4607_v16 = vld [vmem:[%s4156_s24 + $0xca] sm:$0xff]  ;;  %v2431_v29 = vld [vmem:[%s4955_s1 + $0x1a0] sm:$0xff] }
  0x5a   : > { %3605 = vmatpush3.bf16.msra.mxu0 %v3602_v33  ;;  %3220 = vmatprep.mubr.f32.mxu0 %v4480_v44  ;;  %v2405_v33 = vld [vmem:[%s4955_s1 + $0x160] sm:$0xff]  ;;  %v2432_v61 = vld [vmem:[%s4955_s1 + $0x1a8] sm:$0xff] }
  0x5b   : > { %2997 = vmatmul.mubr.f32.gmra.mrb[4].mxu1 %v4263_v7  ;;  %3607 = vmatprep.subr.bf16.mxu0 %v3606_v46 }
  0x5c   : > { %3481 = vmatpush3.bf16.msra.mxu1 %v3478_v43  ;;  %2999 = vmatprep.mubr.f32.mxu1 %v4271_v10  ;;  %v3494_v43 = vpack.c.bf16 %v2406_v34, %v2405_v33  ;;  %v2430_v33 = vld [vmem:[%s4955_s1 + $0x198] sm:$0xff]  ;;  %v607_v34 = vld [vmem:[%s4156_s24 + $0xa] sm:$0xff] }
  0x5d   : > { %3221 = vmatmul.mubr.f32.gmra.mrb[4].mxu0 %v4497_v52  ;;  %3483 = vmatprep.subr.bf16.mxu1 %v3482_v53 }
  0x5e   : > { %3609 = vmatpush3.bf16.msra.mxu0 %v3606_v46  ;;  %3223 = vmatprep.mubr.f32.mxu0 %v4502_v54  ;;  %v4568_v46 = vld [vmem:[%s4156_s24 + $0xaa] sm:$0xff] }
  0x5f   : > { %3000 = vmatmul.mubr.f32.gmra.mrb[6].mxu1 %v4291_v17  ;;  %3611 = vmatprep.subr.bf16.mxu0 %v3610_v56 }
  0x60   : > { %3485 = vmatpush3.bf16.msra.mxu1 %v3482_v53  ;;  %3002 = vmatprep.mubr.f32.mxu1 %v4299_v20  ;;  %v2540_v53 = vld [vmem:[%s4955_s1 + $0x378] sm:$0xff] }
  0x61   : > { %3224 = vmatmul.mubr.f32.gmra.mrb[6].mxu0 %v4519_v3  ;;  %3487 = vmatprep.subr.bf16.mxu1 %v3486_v6  ;;  %v3626_v1 = vpack.c.bf16 %v2540_v53, %v2539_v50  ;;  %v2561_v50 = vld [vmem:[%s4955_s1 + $0x3a0] sm:$0xff]  ;;  %v2562_v53 = vld [vmem:[%s4955_s1 + $0x3a8] sm:$0xff] }
  0x62   : > { %3613 = vmatpush3.bf16.msra.mxu0 %v3610_v56  ;;  %3226 = vmatprep.mubr.f32.mxu0 %v4524_v9  ;;  %v4585_v56 = vld [vmem:[%s4156_s24 + $0xb2] sm:$0xff] }
  0x63   : > { %3003 = vmatmul.mubr.f32.gmra.mrb[8].mxu1 %v4319_v27  ;;  %3615 = vmatprep.subr.bf16.mxu0 %v3614_v12 }
  0x64   : > { %3489 = vmatpush3.bf16.msra.mxu1 %v3486_v6  ;;  %3005 = vmatprep.mubr.f32.mxu1 %v4327_v31  ;;  %v2428_v6 = vld [vmem:[%s4955_s1 + $0x188] sm:$0xff] }
  0x65   : > { %3227 = vmatmul.mubr.f32.gmra.mrb[8].mxu0 %v4541_v22  ;;  %3491 = vmatprep.subr.bf16.mxu1 %v3490_v23  ;;  %v3502_v21 = vpack.c.bf16 %v2428_v6, %v2427_v2  ;;  %v2433_v2 = vld [vmem:[%s4955_s1 + $0x1b0] sm:$0xff]  ;;  %v2434_v6 = vld [vmem:[%s4955_s1 + $0x1b8] sm:$0xff] }
  0x66   : > { %3617 = vmatpush3.bf16.msra.mxu0 %v3614_v12  ;;  %3229 = vmatprep.mubr.f32.mxu0 %v4546_v25  ;;  %v2557_v12 = vld [vmem:[%s4955_s1 + $0x380] sm:$0xff] }
  0x67   : > { %3006 = vmatmul.mubr.f32.gmra.mrb[10].mxu1 %v4347_v38  ;;  %3619 = vmatprep.subr.bf16.mxu0 %v3618_v30 }
  0x68   : > { %3493 = vmatpush3.bf16.msra.mxu1 %v3490_v23  ;;  %3008 = vmatprep.mubr.f32.mxu1 %v4355_v41  ;;  %v3630_v23 = vpack.c.bf16 %v2558_v13, %v2557_v12  ;;  %v3514_v12 = vpack.c.bf16 %v2434_v6, %v2433_v2  ;;  %v4708_v6 = vld [vmem:[%s4156_s24 + $0xc0] sm:$0xff] }
  0x69   : > { %3230 = vmatmul.mubr.f32.gmra.mrb[10].mxu0 %v4563_v40  ;;  %3495 = vmatprep.subr.bf16.mxu1 %v3494_v43 }
  0x6a   : > { %3621 = vmatpush3.bf16.msra.mxu0 %v3618_v30  ;;  %3232 = vmatprep.mubr.f32.mxu0 %v4568_v46  ;;  %v2429_v30 = vld [vmem:[%s4955_s1 + $0x190] sm:$0xff] }
  0x6b   : > { %3009 = vmatmul.mubr.f32.gmra.mrb[12].mxu1 %v4375_v48  ;;  %3623 = vmatprep.subr.bf16.mxu0 %v3622_v47 }
  0x6c   : > { %3497 = vmatpush3.bf16.msra.mxu1 %v3494_v43  ;;  %3011 = vmatprep.mubr.f32.mxu1 %v4383_v51  ;;  %v3506_v43 = vpack.c.bf16 %v2430_v33, %v2429_v30  ;;  %v2566_v30 = vld [vmem:[%s4955_s1 + $0x3c8] sm:$0xff] }
  0x6d   : > { %3233 = vmatmul.mubr.f32.gmra.mrb[12].mxu0 %v4585_v56  ;;  %3499 = vmatprep.subr.bf16.mxu1 %v3498_v57 }
  0x6e   : > { %3625 = vmatpush3.bf16.msra.mxu0 %v3622_v47  ;;  %3235 = vmatprep.mubr.f32.mxu0 %v4590_v60  ;;  %v3634_v47 = vpack.c.bf16 %v2560_v37, %v2559_v36  ;;  %v2437_v36 = vld [vmem:[%s4955_s1 + $0x1d0] sm:$0xff]  ;;  %v2438_v37 = vld [vmem:[%s4955_s1 + $0x1d8] sm:$0xff] }
  0x6f   : > { %3012 = vmatmul.mubr.f32.gmra.mrb[14].mxu1 %v4403_v58  ;;  %3627 = vmatprep.subr.bf16.mxu0 %v3626_v1 }
  0x70   : > { %3501 = vmatpush3.bf16.msra.mxu1 %v3498_v57  ;;  %3046 = vmatprep.mubr.f32.mxu1 %v606_v19  ;;  %v3510_v57 = vpack.c.bf16 %v2432_v61, %v2431_v29  ;;  %v2435_v19 = vld [vmem:[%s4955_s1 + $0x1c0] sm:$0xff]  ;;  %v3522_v29 = vpack.c.bf16 %v2438_v37, %v2437_v36  ;;  %v2590_v36 = vld [vmem:[%s4955_s1 + $0x408] sm:$0xff] }
  0x71   : > { %3236 = vmatmul.mubr.f32.gmra.mrb[14].mxu0 %v4607_v16  ;;  %3503 = vmatprep.subr.bf16.mxu1 %v3502_v21  ;;  %v2524_v37 = vld [vmem:[%s4156_s24 + $0xe0] sm:$0xff] }
  0x72   : > { %3629 = vmatpush3.bf16.msra.mxu0 %v3626_v1  ;;  %3270 = vmatprep.mubr.f32.mxu0 %v4267_v8  ;;  %v3638_v1 = vpack.c.bf16 %v2562_v53, %v2561_v50  ;;  %v2439_v50 = vld [vmem:[%s4955_s1 + $0x1e0] sm:$0xff]  ;;  %v2440_v53 = vld [vmem:[%s4955_s1 + $0x1e8] sm:$0xff] }
  0x73   : > { %3047 = vmatmul.mubr.f32.vlgmr.msra.gmra.mrb[0].mxu1 %v607_v34  ;;  %3631 = vmatprep.subr.bf16.mxu0 %v3630_v23  ;;  %v3526_v2 = vpack.c.bf16 %v2440_v53, %v2439_v50  ;;  %v2593_v50 = vld [vmem:[%s4955_s1 + $0x420] sm:$0xff]  ;;  %v2594_v53 = vld [vmem:[%s4955_s1 + $0x428] sm:$0xff] }
  0x74   : > { %3505 = vmatpush3.bf16.msra.mxu1 %v3502_v21  ;;  %3049 = vmatprep.mubr.f32.mxu1 %v4437_v15  ;;  %v2563_v15 = vld [vmem:[%s4955_s1 + $0x3b0] sm:$0xff]  ;;  %v2436_v21 = vld [vmem:[%s4955_s1 + $0x1c8] sm:$0xff] }
  0x75   : > { %3271 = vmatmul.mubr.f32.vlgmr.msra.gmra.mrb[0].mxu0 %v4281_v14  ;;  %3507 = vmatprep.subr.bf16.mxu1 %v3506_v43  ;;  %v3518_v33 = vpack.c.bf16 %v2436_v21, %v2435_v19  ;;  %v2572_v19 = vld [vmem:[%s4955_s1 + $0x3f8] sm:$0xff]  ;;  %v4725_v21 = vld [vmem:[%s4156_s24 + $0xc8] sm:$0xff] }
  0x76   : > { %3633 = vmatpush3.bf16.msra.mxu0 %v3630_v23  ;;  %3273 = vmatprep.mubr.f32.mxu0 %v4295_v18  ;;  %v2565_v23 = vld [vmem:[%s4955_s1 + $0x3c0] sm:$0xff] }
  0x77   : > { %3050 = vmatmul.mubr.f32.gmra.mrb[2].mxu1 %v4454_v26  ;;  %3635 = vmatprep.subr.bf16.mxu0 %v3634_v47  ;;  %v2564_v26 = vld [vmem:[%s4955_s1 + $0x3b8] sm:$0xff]  ;;  %v3646_v34 = vpack.c.bf16 %v2566_v30, %v2565_v23 }
  0x78   : > { %3509 = vmatpush3.bf16.msra.mxu1 %v3506_v43  ;;  %3052 = vmatprep.mubr.f32.mxu1 %v4458_v32  ;;  %v3642_v13 = vpack.c.bf16 %v2564_v26, %v2563_v15  ;;  %v2567_v43 = vld [vmem:[%s4955_s1 + $0x3d0] sm:$0xff]  ;;  %v2523_v30 = vld [vmem:[%s4156_s24 + $0xd8] sm:$0xff] }
  0x79   : > { %3274 = vmatmul.mubr.f32.gmra.mrb[2].mxu0 %v4309_v24  ;;  %3511 = vmatprep.subr.bf16.mxu1 %v3510_v57  ;;  %v2441_v26 = vld [vmem:[%s4955_s1 + $0x1f0] sm:$0xff] }
  0x7a   : > { %3637 = vmatpush3.bf16.msra.mxu0 %v3634_v47  ;;  %3276 = vmatprep.mubr.f32.mxu0 %v4323_v28  ;;  %v2568_v47 = vld [vmem:[%s4955_s1 + $0x3d8] sm:$0xff] }
  0x7b   : > { %3053 = vmatmul.mubr.f32.gmra.mrb[4].mxu1 %v4475_v42  ;;  %3639 = vmatprep.subr.bf16.mxu0 %v3638_v1  ;;  %v3650_v61 = vpack.c.bf16 %v2568_v47, %v2567_v43  ;;  %v2591_v47 = vld [vmem:[%s4955_s1 + $0x410] sm:$0xff] }
  0x7c   : > { %3513 = vmatpush3.bf16.msra.mxu1 %v3510_v57  ;;  %3055 = vmatprep.mubr.f32.mxu1 %v4480_v44  ;;  %v2569_v57 = vld [vmem:[%s4955_s1 + $0x3e0] sm:$0xff] }
  0x7d   : > { %3277 = vmatmul.mubr.f32.gmra.mrb[4].mxu0 %v4337_v35  ;;  %3515 = vmatprep.subr.bf16.mxu1 %v3514_v12 }
  0x7e   : > { %3641 = vmatpush3.bf16.msra.mxu0 %v3638_v1  ;;  %3279 = vmatprep.mubr.f32.mxu0 %v4351_v39  ;;  %v2570_v1 = vld [vmem:[%s4955_s1 + $0x3e8] sm:$0xff] }
  0x7f   : > { %3056 = vmatmul.mubr.f32.gmra.mrb[6].mxu1 %v4497_v52  ;;  %3643 = vmatprep.subr.bf16.mxu0 %v3642_v13  ;;  %v3654_v15 = vpack.c.bf16 %v2570_v1, %v2569_v57 }
  0x80   : > { %3517 = vmatpush3.bf16.msra.mxu1 %v3514_v12  ;;  %3058 = vmatprep.mubr.f32.mxu1 %v4502_v54  ;;  %v2442_v12 = vld [vmem:[%s4955_s1 + $0x1f8] sm:$0xff] }
  0x81   : > { %3280 = vmatmul.mubr.f32.gmra.mrb[6].mxu0 %v4365_v45  ;;  %3519 = vmatprep.subr.bf16.mxu1 %v3518_v33  ;;  %v3530_v23 = vpack.c.bf16 %v2442_v12, %v2441_v26 }
  0x82   : > { %3645 = vmatpush3.bf16.msra.mxu0 %v3642_v13  ;;  %3282 = vmatprep.mubr.f32.mxu0 %v4379_v49  ;;  %v2571_v13 = vld [vmem:[%s4955_s1 + $0x3f0] sm:$0xff] }
  0x83   : > { %3059 = vmatmul.mubr.f32.gmra.mrb[8].mxu1 %v4519_v3  ;;  %3647 = vmatprep.subr.bf16.mxu0 %v3646_v34 }
  0x84   : > { %3521 = vmatpush3.bf16.msra.mxu1 %v3518_v33  ;;  %3061 = vmatprep.mubr.f32.mxu1 %v4524_v9  ;;  %v3658_v33 = vpack.c.bf16 %v2572_v19, %v2571_v13 }
  0x85   : > { %3283 = vmatmul.mubr.f32.gmra.mrb[8].mxu0 %v4393_v55  ;;  %3523 = vmatprep.subr.bf16.mxu1 %v3522_v29 }
  0x86   : > { %3649 = vmatpush3.bf16.msra.mxu0 %v3646_v34  ;;  %3285 = vmatprep.mubr.f32.mxu0 %v4407_v59  ;;  %v2589_v34 = vld [vmem:[%s4955_s1 + $0x400] sm:$0xff] }
  0x87   : > { %3062 = vmatmul.mubr.f32.gmra.mrb[10].mxu1 %v4541_v22  ;;  %3651 = vmatprep.subr.bf16.mxu0 %v3650_v61  ;;  %v3662_v43 = vpack.c.bf16 %v2590_v36, %v2589_v34 }
  0x88   : > { %3525 = vmatpush3.bf16.msra.mxu1 %v3522_v29  ;;  %3064 = vmatprep.mubr.f32.mxu1 %v4546_v25  ;;  %v2592_v29 = vld [vmem:[%s4955_s1 + $0x418] sm:$0xff] }
  0x89   : > { %3286 = vmatmul.mubr.f32.gmra.mrb[10].mxu0 %v4421_v5  ;;  %3527 = vmatprep.subr.bf16.mxu1 %v3526_v2 }
  0x8a   : > { %3653 = vmatpush3.bf16.msra.mxu0 %v3650_v61  ;;  %3288 = vmatprep.mubr.f32.mxu0 %v4708_v6  ;;  %v3666_v61 = vpack.c.bf16 %v2592_v29, %v2591_v47 }
  0x8b   : > { %3065 = vmatmul.mubr.f32.gmra.mrb[12].mxu1 %v4563_v40  ;;  %3655 = vmatprep.subr.bf16.mxu0 %v3654_v15 }
  0x8c   : > { %3529 = vmatpush3.bf16.msra.mxu1 %v3526_v2  ;;  %3067 = vmatprep.mubr.f32.mxu1 %v4568_v46 }
  0x8d   : > { %3289 = vmatmul.mubr.f32.gmra.mrb[12].mxu0 %v4725_v21  ;;  %3531 = vmatprep.subr.bf16.mxu1 %v3530_v23 }
  0x8e   : > { %3657 = vmatpush3.bf16.msra.mxu0 %v3654_v15  ;;  %3291 = vmatprep.mubr.f32.mxu0 %v2523_v30 }
  0x8f   : > { %3068 = vmatmul.mubr.f32.gmra.mrb[14].mxu1 %v4585_v56  ;;  %3659 = vmatprep.subr.bf16.mxu0 %v3658_v33 }
  0x90   : > { %3533 = vmatpush3.bf16.msra.mxu1 %v3530_v23  ;;  %3102 = vmatprep.mubr.f32.mxu1 %v4240_v62  ;;  %v3670_v62 = vpack.c.bf16 %v2594_v53, %v2593_v50  ;;  %v4846_v23 = vld [vmem:[%s4956_s2] ss:$0 sm:$0xff] }
  0x91   : > { %3292 = vmatmul.mubr.f32.gmra.mrb[14].mxu0 %v2524_v37  ;;  %3694 = vmatprep.subr.bf16.mxu1 %v3662_v43 }
  0x92   : > { %3661 = vmatpush3.bf16.msra.mxu0 %v3658_v33  ;;  %3326 = vmatprep.mubr.f32.mxu0 %v4243_v0  ;;  %v2595_v0 = vld [vmem:[%s4955_s1 + $0x430] sm:$0xff] }
  0x93   : > { %3663 = vmatprep.subr.bf16.mxu0 %v3662_v43  ;;  %3103 = vmatmul.mubr.f32.vlgmr.msra.gmra.mrb[0].mxu1 %v4253_v4  ;;  %v2596_v4 = vld [vmem:[%s4955_s1 + $0x438] sm:$0xff] }
  0x94   : > { %3702 = vmatpush3.bf16.msra.mxu1 %v3662_v43  ;;  %3105 = vmatprep.mubr.f32.mxu1 %v4267_v8  ;;  %v2597_v8 = vld [vmem:[%s4955_s1 + $0x440] sm:$0xff] }
  0x95   : > { %3327 = vmatmul.mubr.f32.vlgmr.msra.gmra.mrb[0].mxu0 %v4263_v7  ;;  %3695 = vmatprep.subr.bf16.mxu1 %v3666_v61  ;;  %v3674_v7 = vpack.c.bf16 %v2596_v4, %v2595_v0 }
  0x96   : > { %3665 = vmatpush3.bf16.msra.mxu0 %v3662_v43  ;;  %3329 = vmatprep.mubr.f32.mxu0 %v4271_v10  ;;  %v2598_v10 = vld [vmem:[%s4955_s1 + $0x448] sm:$0xff] }
  0x97   : > { %3667 = vmatprep.subr.bf16.mxu0 %v3666_v61  ;;  %3106 = vmatmul.mubr.f32.gmra.mrb[2].mxu1 %v4281_v14  ;;  %v3678_v14 = vpack.c.bf16 %v2598_v10, %v2597_v8 }
  0x98   : > { %3703 = vmatpush3.bf16.msra.mxu1 %v3666_v61  ;;  %3108 = vmatprep.mubr.f32.mxu1 %v4295_v18  ;;  %v2600_v18 = vld [vmem:[%s4955_s1 + $0x458] sm:$0xff] }
  0x99   : > { %3330 = vmatmul.mubr.f32.gmra.mrb[2].mxu0 %v4291_v17  ;;  %3696 = vmatprep.subr.bf16.mxu1 %v3670_v62  ;;  %v2599_v17 = vld [vmem:[%s4955_s1 + $0x450] sm:$0xff] }
  0x9a   : > { %3669 = vmatpush3.bf16.msra.mxu0 %v3666_v61  ;;  %3332 = vmatprep.mubr.f32.mxu0 %v4299_v20  ;;  %v3682_v20 = vpack.c.bf16 %v2600_v18, %v2599_v17 }
  0x9b   : > { %3671 = vmatprep.subr.bf16.mxu0 %v3670_v62  ;;  %3109 = vmatmul.mubr.f32.gmra.mrb[4].mxu1 %v4309_v24  ;;  %v2601_v24 = vld [vmem:[%s4955_s1 + $0x460] sm:$0xff] }
  0x9c   : > { %3704 = vmatpush3.bf16.msra.mxu1 %v3670_v62  ;;  %3111 = vmatprep.mubr.f32.mxu1 %v4323_v28 }
  0x9d   : > { %3333 = vmatmul.mubr.f32.gmra.mrb[4].mxu0 %v4319_v27  ;;  %3697 = vmatprep.subr.bf16.mxu1 %v3674_v7  ;;  %v2602_v27 = vld [vmem:[%s4955_s1 + $0x468] sm:$0xff] }
  0x9e   : > { %3673 = vmatpush3.bf16.msra.mxu0 %v3670_v62  ;;  %3335 = vmatprep.mubr.f32.mxu0 %v4327_v31  ;;  %v3686_v28 = vpack.c.bf16 %v2602_v27, %v2601_v24  ;;  %v2603_v31 = vld [vmem:[%s4955_s1 + $0x470] sm:$0xff] }
  0x9f   : > { %3675 = vmatprep.subr.bf16.mxu0 %v3674_v7  ;;  %3112 = vmatmul.mubr.f32.gmra.mrb[6].mxu1 %v4337_v35  ;;  %v2604_v35 = vld [vmem:[%s4955_s1 + $0x478] sm:$0xff] }
  0xa0   : > { %3705 = vmatpush3.bf16.msra.mxu1 %v3674_v7  ;;  %3114 = vmatprep.mubr.f32.mxu1 %v4351_v39  ;;  %v2555_v39 = vld [vmem:[%s4156_s24 + $0xd9] sm:$0xff] }
  0xa1   : > { %3336 = vmatmul.mubr.f32.gmra.mrb[6].mxu0 %v4347_v38  ;;  %3698 = vmatprep.subr.bf16.mxu1 %v3678_v14  ;;  %v3690_v38 = vpack.c.bf16 %v2604_v35, %v2603_v31 }
  0xa2   : > { %3677 = vmatpush3.bf16.msra.mxu0 %v3674_v7  ;;  %3338 = vmatprep.mubr.f32.mxu0 %v4355_v41  ;;  %v2556_v41 = vld [vmem:[%s4156_s24 + $0xe1] sm:$0xff] }
  0xa3   : > { %3679 = vmatprep.subr.bf16.mxu0 %v3678_v14  ;;  %3115 = vmatmul.mubr.f32.gmra.mrb[8].mxu1 %v4365_v45  ;;  %v2587_v45 = vld [vmem:[%s4156_s24 + $0xda] sm:$0xff] }
  0xa4   : > { %3706 = vmatpush3.bf16.msra.mxu1 %v3678_v14  ;;  %3117 = vmatprep.mubr.f32.mxu1 %v4379_v49 }
  0xa5   : > { %3339 = vmatmul.mubr.f32.gmra.mrb[8].mxu0 %v4375_v48  ;;  %3699 = vmatprep.subr.bf16.mxu1 %v3682_v20  ;;  %v2588_v48 = vld [vmem:[%s4156_s24 + $0xe2] sm:$0xff]  ;;  %s175_s24 = sand.u32 1, %s3982_s13  }
  0xa6   : > { %3681 = vmatpush3.bf16.msra.mxu0 %v3678_v14  ;;  %3341 = vmatprep.mubr.f32.mxu0 %v4383_v51  ;;  %s2373_s8 = sshll.u32 %s175_s24, 7  ;;  %s4902_s7 = scalar_lea.sflag [#allocation4], %s175_s24 }
  0xa7   : > { %3683 = vmatprep.subr.bf16.mxu0 %v3682_v20  ;;  %3118 = vmatmul.mubr.f32.gmra.mrb[10].mxu1 %v4393_v55  ;;  %s4854_s21 = scalar_lea.vmem [#allocation3], %s2373_s8 }
  0xa8   : > { %3707 = vmatpush3.bf16.msra.mxu1 %v3682_v20  ;;  %3120 = vmatprep.mubr.f32.mxu1 %v4407_v59  ;;  %s2282_s4 = sshll.u32 %s4854_s21, 4  ;;  %s4894_s4 = int_to_ptr.vmem [resolvable:$true] %s2282_s4 }
  0xa9   : > { %3342 = vmatmul.mubr.f32.gmra.mrb[10].mxu0 %v4403_v58  ;;  %3700 = vmatprep.subr.bf16.mxu1 %v3686_v28  ;;  %s3912_s9 = scalar_lea.vmem %s4894_s4, 2048  ;;  %p3919_p2 = scmp.lt.s32.totalorder %s4894_s4, %s3917_s11 }
  0xaa   : > { %3685 = vmatpush3.bf16.msra.mxu0 %v3682_v20  ;;  %3344 = vmatprep.mubr.f32.mxu0 %v4411_v63  ;;  %p3913_p13 = scmp.ne.s32.totalorder %s4894_s4, %s3912_s9  ;;  %p3920_p4 = scmp.lt.s32.totalorder %s3918_s20, %s3912_s9 }
  0xab   : > { %3687 = vmatprep.subr.bf16.mxu0 %v3686_v28  ;;  %3121 = vmatmul.mubr.f32.gmra.mrb[12].mxu1 %v4421_v5 }
  0xac   : > { %3708 = vmatpush3.bf16.msra.mxu1 %v3686_v28  ;;  %3123 = vmatprep.mubr.f32.mxu1 %v4708_v6  ;;  %p3914_p0 = pnand %p3913_p13, %p4082_p3  ;;  %p3921_p5 = por %p3920_p4, %p3919_p2 }
  0xad   : > { %3345 = vmatmul.mubr.f32.gmra.mrb[12].mxu0 %v4431_v11  ;;  %3701 = vmatprep.subr.bf16.mxu1 %v3690_v38 }
  0xae   : > { %3689 = vmatpush3.bf16.msra.mxu0 %v3686_v28  ;;  %3347 = vmatprep.mubr.f32.mxu0 %v2555_v39  ;;  %p3915_p1 = pneg %p3914_p0 }
  0xaf   : > { %3691 = vmatprep.subr.bf16.mxu0 %v3690_v38  ;;  %3124 = vmatmul.mubr.f32.gmra.mrb[14].mxu1 %v4725_v21 }
  0xb0   : > { %3709 = vmatpush3.bf16.msra.mxu1 %v3690_v38  ;;  %3394 = vmatprep.mubr.f32.mxu1 %v4546_v25  ;;  %p3922_p6 = pnand %p3921_p5, %p3915_p1 }
  0xb1   : > { %3348 = vmatmul.mubr.f32.gmra.mrb[14].mxu0 %v2556_v41 }
  0xb2   : > { %3693 = vmatpush3.bf16.msra.mxu0 %v3690_v38  ;;  %3382 = vmatprep.mubr.f32.mxu0 %v4458_v32 }
  0xb3   : > { %3395 = vmatmul.mubr.f32.vlgmr.msra.gmra.mrb[16].mxu1 %v4563_v40 }
  0xb4   : > { %3397 = vmatprep.mubr.f32.mxu1 %v4568_v46 }
  0xb5   : > { %3383 = vmatmul.mubr.f32.vlgmr.msra.gmra.mrb[0].mxu0 %v4475_v42 }
  0xb6   : > { %3385 = vmatprep.mubr.f32.mxu0 %v4480_v44 }
  0xb7   : > { %3398 = vmatmul.mubr.f32.gmra.mrb[18].mxu1 %v4585_v56 }
  0xb8   : > { %3400 = vmatprep.mubr.f32.mxu1 %v4590_v60 }
  0xb9   : > { %3386 = vmatmul.mubr.f32.gmra.mrb[2].mxu0 %v4497_v52 }
  0xba   : > { %3388 = vmatprep.mubr.f32.mxu0 %v4502_v54 }
  0xbb   : > { %3401 = vmatmul.mubr.f32.gmra.mrb[20].mxu1 %v4607_v16 }
  0xbc   : > { %3403 = vmatprep.mubr.f32.mxu1 %v2587_v45 }
  0xbd   : > { %3389 = vmatmul.mubr.f32.gmra.mrb[4].mxu0 %v4519_v3 }
  0xbe   : > { %3391 = vmatprep.mubr.f32.mxu0 %v4524_v9 }
  0xbf   : > { %3404 = vmatmul.mubr.f32.gmra.mrb[22].mxu1 %v2588_v48 }
  0xc1   : > { %3392 = vmatmul.mubr.f32.gmra.mrb[6].mxu0 %v4541_v22 }
 0x166   : > { %v3104_v49 = vpop.f32.mrb[0].mxu1 }
 0x167   : > { %v934_v51 = vpop.f32.mrb[1].mxu1 }
 0x16a   : > { %v3107_v55 = vpop.f32.mrb[2].mxu1 }
 0x16b   : > { %v944_v58 = vpop.f32.mrb[3].mxu1 }
 0x16e   : > { %v4830_v59 = vpop.f32.mrb[4].mxu1 }
 0x16f   : > { %v4832_v63 = vpop.f32.mrb[5].mxu1 }
 0x172   : > { %v4834_v5 = vpop.f32.mrb[6].mxu1 }
 0x173   : > { %v4836_v11 = vpop.f32.mrb[7].mxu1 }
 0x176   : > { %v3116_v32 = vpop.f32.mrb[8].mxu1 }
 0x177   : > { %v974_v44 = vpop.f32.mrb[9].mxu1 }
 0x178   : > { %v3340_v42 = vpop.f32.mrb[8].mxu0 }
 0x179   : > { %v3718_v52 = vadd.f32 %v3340_v42, %v3116_v32  ;;  %v1881_v54 = vpop.f32.mrb[9].mxu0 }
 0x17a   : > { %v3720_v3 = vadd.f32 %v1881_v54, %v974_v44  ;;  %v3119_v9 = vpop.f32.mrb[10].mxu1 }
 0x17b   : > { %v984_v25 = vpop.f32.mrb[11].mxu1 }
 0x17c   : > { %v3343_v22 = vpop.f32.mrb[10].mxu0 }
 0x17d   : > { %v3722_v40 = vadd.f32 %v3343_v22, %v3119_v9  ;;  %v1891_v46 = vpop.f32.mrb[11].mxu0 }
 0x17e   : > { %v3724_v56 = vadd.f32 %v1891_v46, %v984_v25  ;;  %v3122_v60 = vpop.f32.mrb[12].mxu1 }
 0x17f   : > { %v994_v57 = vpop.f32.mrb[13].mxu1 }
 0x180   : > { %v3346_v16 = vpop.f32.mrb[12].mxu0 }
 0x181   : > { %v3726_v1 = vadd.f32 %v3346_v16, %v3122_v60  ;;  %v1901_v2 = vpop.f32.mrb[13].mxu0 }
 0x182   : > { %v3728_v6 = vadd.f32 %v1901_v2, %v994_v57  ;;  %v3125_v15 = vpop.f32.mrb[14].mxu1 }
 0x183   : > { %v1004_v12 = vpop.f32.mrb[15].mxu1 }
 0x184   : > { %v3349_v26 = vpop.f32.mrb[14].mxu0 }
 0x185   : > { %v4838_v13 = vadd.f32 %v3349_v26, %v3125_v15  ;;  %v1911_v19 = vpop.f32.mrb[15].mxu0 }
 0x186   : > { %v4841_v21 = vadd.f32 %v1911_v19, %v1004_v12  ;;  %v3396_v30 = vpop.f32.mrb[16].mxu1 }
 0x187   : > { %v3719_v34 = vadd.f32 %v3718_v52, %v3396_v30  ;;  %v2107_v36 = vpop.f32.mrb[17].mxu1 }
 0x188   : > { %v3384_v33 = vpop.f32.mrb[0].mxu0  ;;  %v3721_v47 = vadd.f32 %v3720_v3, %v2107_v36 }
 0x189   : > { %v3710_v37 = vadd.f32 %v3384_v33, %v3104_v49  ;;  %v2067_v43 = vpop.f32.mrb[1].mxu0  ;;  %v2226_v29 = vadd.f32 %v3719_v34, %v4846_v23 }
 0x18a   : > { %v3711_v61 = vadd.f32 %v2067_v43, %v934_v51  ;;  %v2225_v53 = vadd.f32 %v3721_v47, %v4846_v23  ;;  %v3399_v62 = vpop.f32.mrb[18].mxu1 }
 0x18b   : > { %v2218_v50 = vadd.f32 %v3710_v37, %v4846_v23  ;;  %v2242_v0 = vmax.f32 %v2226_v29, 0.0  ;;  %v3723_v8 = vadd.f32 %v3722_v40, %v3399_v62  ;;  %v2117_v10 = vpop.f32.mrb[19].mxu1 }
 0x18c   : > { %v2217_v4 = vadd.f32 %v3711_v61, %v4846_v23  ;;  %v3387_v7 = vpop.f32.mrb[2].mxu0  ;;  %v2241_v17 = vmax.f32 %v2225_v53, 0.0  ;;  %v3725_v24 = vadd.f32 %v3724_v56, %v2117_v10 }
 0x18d   : > { %v2234_v14 = vmax.f32 %v2218_v50, 0.0  ;;  %v3712_v18 = vadd.f32 %v3387_v7, %v3107_v55  ;;  %v2077_v20 = vpop.f32.mrb[3].mxu0  ;;  %2258 = vst [vmem:[%s4854_s21 + $0x48] sm:$0xff] %v2242_v0  ;;  %v2228_v28 = vadd.f32 %v3723_v8, %v4846_v23 }
 0x18e   : > { %v2233_v27 = vmax.f32 %v2217_v4, 0.0  ;;  %v3713_v31 = vadd.f32 %v2077_v20, %v944_v58  ;;  %2257 = vst [vmem:[%s4854_s21 + $0x40] sm:$0xff] %v2241_v17  ;;  %v2227_v38 = vadd.f32 %v3725_v24, %v4846_v23  ;;  %v3402_v39 = vpop.f32.mrb[20].mxu1 }
 0x18f   : > { %2250 = vst [vmem:[%s4854_s21 + $0x8] sm:$0xff] %v2234_v14  ;;  %v2220_v35 = vadd.f32 %v3712_v18, %v4846_v23  ;;  %v2244_v41 = vmax.f32 %v2228_v28, 0.0  ;;  %v3727_v49 = vadd.f32 %v3726_v1, %v3402_v39  ;;  %v2127_v51 = vpop.f32.mrb[21].mxu1 }
 0x190   : > { %2249 = vst [vmem:[%s4854_s21] sm:$0xff] %v2233_v27  ;;  %v2219_v45 = vadd.f32 %v3713_v31, %v4846_v23  ;;  %v3390_v48 = vpop.f32.mrb[4].mxu0  ;;  %v2243_v58 = vmax.f32 %v2227_v38, 0.0  ;;  %v3729_v44 = vadd.f32 %v3728_v6, %v2127_v51 }
 0x191   : > { %v2236_v55 = vmax.f32 %v2220_v35, 0.0  ;;  %v3714_v32 = vadd.f32 %v3390_v48, %v4830_v59  ;;  %v2087_v42 = vpop.f32.mrb[5].mxu0  ;;  %2260 = vst [vmem:[%s4854_s21 + $0x58] sm:$0xff] %v2244_v41  ;;  %v2230_v54 = vadd.f32 %v3727_v49, %v4846_v23 }
 0x192   : > { %v2235_v52 = vmax.f32 %v2219_v45, 0.0  ;;  %v3715_v3 = vadd.f32 %v2087_v42, %v4832_v63  ;;  %2259 = vst [vmem:[%s4854_s21 + $0x50] sm:$0xff] %v2243_v58  ;;  %v2229_v22 = vadd.f32 %v3729_v44, %v4846_v23  ;;  %v3405_v25 = vpop.f32.mrb[22].mxu1 }
 0x193   : > { %2252 = vst [vmem:[%s4854_s21 + $0x18] sm:$0xff] %v2236_v55  ;;  %v2222_v9 = vadd.f32 %v3714_v32, %v4846_v23  ;;  %v2246_v59 = vmax.f32 %v2230_v54, 0.0  ;;  %v3731_v56 = vadd.f32 %v4838_v13, %v3405_v25  ;;  %v2137_v63 = vpop.f32.mrb[23].mxu1 }
 0x194   : > { %2251 = vst [vmem:[%s4854_s21 + $0x10] sm:$0xff] %v2235_v52  ;;  %v2221_v40 = vadd.f32 %v3715_v3, %v4846_v23  ;;  %v3393_v46 = vpop.f32.mrb[6].mxu0  ;;  %v2245_v16 = vmax.f32 %v2229_v22, 0.0  ;;  %v3733_v2 = vadd.f32 %v4841_v21, %v2137_v63 }
 0x195   : > { %v2238_v60 = vmax.f32 %v2222_v9, 0.0  ;;  %v3716_v57 = vadd.f32 %v3393_v46, %v4834_v5  ;;  %v2097_v1 = vpop.f32.mrb[7].mxu0  ;;  %2262 = vst [vmem:[%s4854_s21 + $0x68] sm:$0xff] %v2246_v59  ;;  %v2232_v15 = vadd.f32 %v3731_v56, %v4846_v23 }
 0x196   : > { %v2237_v6 = vmax.f32 %v2221_v40, 0.0  ;;  %v3717_v26 = vadd.f32 %v2097_v1, %v4836_v11  ;;  %2261 = vst [vmem:[%s4854_s21 + $0x60] sm:$0xff] %v2245_v16  ;;  %v2231_v12 = vadd.f32 %v3733_v2, %v4846_v23 }
 0x197   : > { %2254 = vst [vmem:[%s4854_s21 + $0x28] sm:$0xff] %v2238_v60  ;;  %v2224_v5 = vadd.f32 %v3716_v57, %v4846_v23  ;;  %v2248_v13 = vmax.f32 %v2232_v15, 0.0 }
 0x198   : > { %2253 = vst [vmem:[%s4854_s21 + $0x20] sm:$0xff] %v2237_v6  ;;  %v2223_v19 = vadd.f32 %v3717_v26, %v4846_v23  ;;  %v2247_v30 = vmax.f32 %v2231_v12, 0.0 }
 0x199   : > { %v2240_v21 = vmax.f32 %v2224_v5, 0.0  ;;  %2264 = vst [vmem:[%s4854_s21 + $0x78] sm:$0xff] %v2248_v13 }
 0x19a   : > { %v2239_v11 = vmax.f32 %v2223_v19, 0.0  ;;  %2263 = vst [vmem:[%s4854_s21 + $0x70] sm:$0xff] %v2247_v30 }
 0x19b   : > { %2256 = vst [vmem:[%s4854_s21 + $0x38] sm:$0xff] %v2240_v21 }
 0x19c   : > { %2255 = vst [vmem:[%s4854_s21 + $0x30] sm:$0xff] %v2239_v11 }
 0x19d   : > { %3925 = shalt.err (!%p3922_p6)
}
 0x19e   : > { %s3926_s24 = scalar_lea.hbm %s4892_s27, 2048  ;;  %s3930_s29 = scalar_lea.hbm %s4957_s3, 8192 }
 0x19f   : > { %p3927_p7 = scmp.ne.s32.totalorder %s4892_s27, %s3926_s24  ;;  %p3931_p11 = scmp.lt.u32.totalorder %s4892_s27, %s4957_s3 }
 0x1a0   : > { %p3932_p12 = scmp.lt.u32.totalorder %s3930_s29, %s3926_s24  ;;  %p3934_p0 = scmp.lt.u32.totalorder %s3926_s24, %s4892_s27 }
 0x1a1   : > { %p3928_p9 = pnand %p3927_p7, %p4082_p3 }
 0x1a2   : > { %p3933_p13 = por %p3932_p12, %p3931_p11 }
 0x1a3   : > { %p3929_p10 = pneg %p3928_p9 }
 0x1a4   : > { %p3935_p1 = por %p3934_p0, %p3933_p13 }
 0x1a6   : > { %p3936_p2 = pnand %p3935_p1, %p3929_p10 }
 0x1a8   : > { %3939 = shalt.err (!%p3936_p2)
}
 0x1a9   : > { %s4009_s16 = smov 128   ;;  %s4010_s5 = smov 8  }
 0x1aa   : > { %3839 = dma.vmem_to_hbm [thread:$0]  (%p4082_p3), %s4894_s4, 2048, %s4892_s27, %s4902_s7, %s4009_s16, %s4009_s16, %s4010_s5  }
 0x1ab PF: > { %p3845_p4 = scmp.ge.s32.totalorder %s4006_s19, 2  ;;  %s2297_s6 = sand.u32 1, %s3978_s12  }
 0x1ac   : > { %s2298_s9 = scalar_lea.sflag [#allocation4], %s2297_s6 }
 0x1ad   : > { %p3842_p5 = pnand %p3845_p4, %p4091_p8 }
 0x1af   : > { %3973 = dma.done.wait (!%p3842_p5), %s2298_s9, 2048  }
 0x1b0   : > { %3975 = vsyncadd (!%p3842_p5), %s2298_s9, 4294965248  ;;  %s16_s19 = sadd.s32 1, %s4006_s19   ;;  %s4960_s12 = smov %s3982_s13 }
 0x1b1   : > { %p13_p6 = scmp.ge.s32.totalorder %s16_s19, 6   ;;  %s4961_s13 = smov %s3986_s14 }
 0x1b2   : > { %s4962_s14 = smov %s4100_s30  ;;  %s4963_s15 = smov %s3998_s17 }
 0x1b3   : > { %s4964_s16 = smov %s4002_s18  ;;  %s4965_s17 = smov %s4968_s22 }
 0x1b4   : > { %s4966_s18 = smov %s4972_s23  ;;  %15 = sbr.rel (!%p13_p6) target bundleno = 5 (0x5), region = 78 }
 0x1bb   :  { %2303 = vsyncpa [#allocation4], 1 }
 0x1bc   :  { %2305 = vsyncpa [#allocation4 + $0x1], 1 }

</bundles_post_ra>
